<compile_context>
chip_gen: v7x
topology: tpu7x:2x2x1
jax: 0.10.0
libtpu: 0.0.40
codegen_flags: <defaults>
</compile_context>

<pallas_src>
import math
import functools

import jax
import jax.numpy as jnp
from jax import lax
from jax.experimental import pallas as pl
from jax.experimental.pallas import tpu as pltpu

F32 = jnp.float32
BF16 = jnp.bfloat16
LN_EPS = 1e-5  # nn.LayerNorm default


# ----------------------------- in-kernel helpers -----------------------------

def _layernorm(x, g, b, eps):
    # Single-pass stats: sum and sum-of-squares reductions are independent.
    mu = jnp.mean(x, axis=-1, keepdims=True)
    ms = jnp.mean(x * x, axis=-1, keepdims=True)
    var = ms - mu * mu
    return (x - mu) * lax.rsqrt(var + eps) * g + b


def _gelu_tanh(x):
    # NewGELUActivation from the reference (tanh approximation).
    c = math.sqrt(2.0 / math.pi)
    return 0.5 * x * (1.0 + jnp.tanh(c * (x + 0.044715 * x * x * x)))


# ----------------------------- fused encoder kernel -----------------------------

def _encoder_kernel(x_ref,
                    ln1_g, ln1_b, wqkv, bqkv, wo, bo,
                    ln2_g, ln2_b, w1, b1, w2, b2,
                    o_ref, x_vmem,
                    *, batch, seq, d_model, n_heads, eps):
    l = pl.program_id(0)
    B, S, D, H = batch, seq, d_model, n_heads
    dk = D // H
    scale = 1.0 / math.sqrt(dk)

    @pl.when(l == 0)
    def _():
        # Load the (B*S, D) activation slab once; it stays resident in VMEM
        # for all L layers.
        x_vmem[...] = x_ref[...]

    x = x_vmem[...]                                           # (B*S, D) f32

    # ---- LayerNorm1 + fused QKV projection (bf16 MXU operands, f32 accum) ----
    h = _layernorm(x, ln1_g[...], ln1_b[...], eps).astype(BF16)
    qkv = jnp.dot(h, wqkv[...], preferred_element_type=F32) + bqkv[...]   # (B*S, 3D) f32

    # ---- multi-head attention as two head-batched contractions ----
    def gather_heads(col0):
        # (B*S, dk) static lane slices -> (B, S, dk) leading-dim split ->
        # stacked into a single (H*B, S, dk) batch for one batched matmul.
        parts = [qkv[:, col0 + hh * dk: col0 + (hh + 1) * dk].reshape(B, S, dk)
                 for hh in range(H)]
        return jnp.concatenate(parts, axis=0).astype(BF16)    # (H*B, S, dk)

    q = gather_heads(0)
    k = gather_heads(D)
    v = gather_heads(2 * D)

    s = jnp.einsum('bqd,bkd->bqk', q, k,
                   preferred_element_type=F32) * scale        # (H*B, S, S)
    m = jnp.max(s, axis=-1, keepdims=True)
    p = jnp.exp(s - m)
    p = p * pl.reciprocal(jnp.sum(p, axis=-1, keepdims=True), approx=True)
    a = jnp.einsum('bqk,bkd->bqd', p.astype(BF16), v,
                   preferred_element_type=F32)                # (H*B, S, dk)

    attn = jnp.concatenate(
        [a[hh * B:(hh + 1) * B].reshape(B * S, dk) for hh in range(H)],
        axis=-1)                                              # (B*S, D)

    # ---- output projection + residual ----
    x = x + jnp.dot(attn.astype(BF16), wo[...],
                    preferred_element_type=F32) + bo[...]

    # ---- LayerNorm2 + MLP + residual ----
    h = _layernorm(x, ln2_g[...], ln2_b[...], eps).astype(BF16)
    h = _gelu_tanh(jnp.dot(h, w1[...], preferred_element_type=F32) + b1[...])
    h = jnp.dot(h.astype(BF16), w2[...], preferred_element_type=F32) + b2[...]
    x = x + h

    x_vmem[...] = x                                           # carry to next layer

    @pl.when(l == pl.num_programs(0) - 1)
    def _():
        o_ref[...] = x


_PARAM_NAMES = ("ln1_g", "ln1_b", "wqkv", "bqkv", "wo", "bo",
                "ln2_g", "ln2_b", "w1", "b1", "w2", "b2")
_MXU_WEIGHTS = frozenset({"wqkv", "wo", "w1", "w2"})


def _stack_params(blocks):
    """Stack per-layer params with a leading L axis; matmul weights -> bf16."""
    stacked = []
    for name in _PARAM_NAMES:
        w = jnp.stack([blk[name] for blk in blocks], axis=0)
        if name in _MXU_WEIGHTS:
            w = w.astype(BF16)   # MXU-native dtype, half the weight DMA/VMEM
        stacked.append(w)
    return stacked


def encoder_forward(params, x, n_heads):
    """Whole encoder == ONE pallas_call; grid iterates over layers."""
    B, S, D = x.shape
    blocks = params["blocks"]
    L = len(blocks)
    weights = _stack_params(blocks)

    def w_spec(w):
        nd = w.ndim
        # Leading layer dim is squeezed (None); weight blocks are auto
        # double-buffered over the layer grid axis -> next layer's weights
        # prefetch behind current-layer compute.
        return pl.BlockSpec((None,) + w.shape[1:],
                            lambda l, _n=nd: (l,) + (0,) * (_n - 1))

    x2 = x.reshape(B * S, D)   # fold batch into the MXU M dimension (free in XLA)

    out = pl.pallas_call(
        functools.partial(_encoder_kernel, batch=B, seq=S, d_model=D,
                          n_heads=n_heads, eps=LN_EPS),
        out_shape=jax.ShapeDtypeStruct((B * S, D), F32),
        grid_spec=pltpu.PrefetchScalarGridSpec(
            num_scalar_prefetch=0,
            grid=(L,),
            in_specs=[pl.BlockSpec((B * S, D), lambda l: (0, 0))]
                     + [w_spec(w) for w in weights],
            out_specs=pl.BlockSpec((B * S, D), lambda l: (0, 0)),
            scratch_shapes=[pltpu.VMEM((B * S, D), F32)],
        ),
        compiler_params=pltpu.CompilerParams(
            dimension_semantics=("arbitrary",)),   # layers are sequential
    )(x2, *weights)
    return out.reshape(B, S, D)


# ----------------------------- pure-JAX reference -----------------------------

def _ref_block(x, p, n_heads, eps=LN_EPS):
    B, S, D = x.shape
    dk = D // n_heads

    def ln(z, g, b):
        mu = z.mean(-1, keepdims=True)
        var = ((z - mu) ** 2).mean(-1, keepdims=True)
        return (z - mu) / jnp.sqrt(var + eps) * g.reshape(-1) + b.reshape(-1)

    h = ln(x, p["ln1_g"], p["ln1_b"])
    qkv = h @ p["wqkv"] + p["bqkv"].reshape(-1)
    q, k, v = jnp.split(qkv, 3, axis=-1)

    def heads(t):
        return t.reshape(B, S, n_heads, dk).transpose(0, 2, 1, 3)

    q, k, v = heads(q), heads(k), heads(v)
    s = (q @ jnp.swapaxes(k, -1, -2)) / math.sqrt(dk)
    attn = jax.nn.softmax(s, axis=-1)
    a = (attn @ v).transpose(0, 2, 1, 3).reshape(B, S, D)
    x = x + a @ p["wo"] + p["bo"].reshape(-1)

    h = ln(x, p["ln2_g"], p["ln2_b"])
    h = h @ p["w1"] + p["b1"].reshape(-1)
    c = math.sqrt(2.0 / math.pi)
    h = 0.5 * h * (1.0 + jnp.tanh(c * (h + 0.044715 * h ** 3)))
    h = h @ p["w2"] + p["b2"].reshape(-1)
    return x + h


def encoder_reference(params, x, n_heads):
    for blk in params["blocks"]:
        x = _ref_block(x, blk, n_heads)
    return x


# ----------------------------- parameter init -----------------------------

def init_encoder_params(key, *, d_model, n_heads, n_layers, mlp_ratio=4, scale=0.02):
    assert d_model % n_heads == 0
    inter = mlp_ratio * d_model
    blocks = []
    for lk in jax.random.split(key, n_layers):
        ks = jax.random.split(lk, 8)
        blocks.append({
            "ln1_g": jnp.ones((1, d_model), F32),
            "ln1_b": jnp.zeros((1, d_model), F32),
            # w_q|w_k|w_v fused into one (D, 3D) weight (and (1, 3D) bias).
            "wqkv": scale * jax.random.normal(ks[0], (d_model, 3 * d_model), F32),
            "bqkv": scale * jax.random.normal(ks[1], (1, 3 * d_model), F32),
            "wo": scale * jax.random.normal(ks[2], (d_model, d_model), F32),
            "bo": scale * jax.random.normal(ks[3], (1, d_model), F32),
            "ln2_g": jnp.ones((1, d_model), F32),
            "ln2_b": jnp.zeros((1, d_model), F32),
            "w1": scale * jax.random.normal(ks[4], (d_model, inter), F32),
            "b1": scale * jax.random.normal(ks[5], (1, inter), F32),
            "w2": scale * jax.random.normal(ks[6], (inter, d_model), F32),
            "b2": scale * jax.random.normal(ks[7], (1, d_model), F32),
        })
    return {"blocks": blocks}


# ----------------------------- main -----------------------------

if __name__ == "__main__":
    B, S, D, H, L = 2, 8, 32, 4, 2     # batch, seq, d_model, heads, layers

    key = jax.random.PRNGKey(0)
    kp, kx = jax.random.split(key)
    params = init_encoder_params(kp, d_model=D, n_heads=H, n_layers=L)
    x = jax.random.normal(kx, (B, S, D), F32)

    fwd = jax.jit(lambda x: encoder_forward(params, x, n_heads=H))
    y = fwd(x)
    jax.block_until_ready(y)

    y_ref = encoder_reference(params, x, n_heads=H)
    max_err = float(jnp.max(jnp.abs(y - y_ref)))

    assert y.shape == (B, S, D)
    assert bool(jnp.all(jnp.isfinite(y)))
    # Tolerance accounts for bf16 MXU operands + approx softmax reciprocal
    # versus the f32 reference; real bugs produce errors orders of magnitude larger.
    assert max_err < 5e-3, f"mismatch vs reference: {max_err}"
    print("KERNEL_OK")
</pallas_src>

<mosaic_0001>
module attributes {stable_mosaic.version = 11 : i64} {
  func.func @_encoder_kernel(%arg0: i32, %arg1: memref<16x32xf32, #tpu.memory_space<vmem>>, %arg2: memref<1x1x32xf32, #tpu.memory_space<vmem>>, %arg3: memref<1x1x32xf32, #tpu.memory_space<vmem>>, %arg4: memref<1x32x96xbf16, #tpu.memory_space<vmem>>, %arg5: memref<1x1x96xf32, #tpu.memory_space<vmem>>, %arg6: memref<1x32x32xbf16, #tpu.memory_space<vmem>>, %arg7: memref<1x1x32xf32, #tpu.memory_space<vmem>>, %arg8: memref<1x1x32xf32, #tpu.memory_space<vmem>>, %arg9: memref<1x1x32xf32, #tpu.memory_space<vmem>>, %arg10: memref<1x32x128xbf16, #tpu.memory_space<vmem>>, %arg11: memref<1x1x128xf32, #tpu.memory_space<vmem>>, %arg12: memref<1x128x32xbf16, #tpu.memory_space<vmem>>, %arg13: memref<1x1x32xf32, #tpu.memory_space<vmem>>, %arg14: memref<16x32xf32, #tpu.memory_space<vmem>>, %arg15: memref<16x32xf32, #tpu.memory_space<vmem>>) attributes {dimension_semantics = [#tpu.dimension_semantics<arbitrary>], iteration_bounds = array<i64: 2>, scalar_prefetch = 0 : i64, scratch_operands = 1 : i64, tpu.core_type = #tpu.core_type<tc>, window_params = [{pipeline_mode = #tpu.pipeline_mode<synchronous>, transform_indices = @transform_0, window_bounds = array<i64: 16, 32>}, {transform_indices = @transform_1, window_bounds = array<i64: 1, 1, 32>}, {transform_indices = @transform_2, window_bounds = array<i64: 1, 1, 32>}, {transform_indices = @transform_3, window_bounds = array<i64: 1, 32, 96>}, {transform_indices = @transform_4, window_bounds = array<i64: 1, 1, 96>}, {transform_indices = @transform_5, window_bounds = array<i64: 1, 32, 32>}, {transform_indices = @transform_6, window_bounds = array<i64: 1, 1, 32>}, {transform_indices = @transform_7, window_bounds = array<i64: 1, 1, 32>}, {transform_indices = @transform_8, window_bounds = array<i64: 1, 1, 32>}, {transform_indices = @transform_9, window_bounds = array<i64: 1, 32, 128>}, {transform_indices = @transform_10, window_bounds = array<i64: 1, 1, 128>}, {transform_indices = @transform_11, window_bounds = array<i64: 1, 128, 32>}, {transform_indices = @transform_12, window_bounds = array<i64: 1, 1, 32>}, {pipeline_mode = #tpu.pipeline_mode<synchronous>, transform_indices = @transform_13, window_bounds = array<i64: 16, 32>}]} {
    %c0_i32 = arith.constant 0 : i32
    %0 = arith.cmpi eq, %arg0, %c0_i32 : i32
    %1 = arith.extui %0 : i1 to i32
    %c0_i32_0 = arith.constant 0 : i32
    %2 = arith.cmpi ne, %1, %c0_i32_0 : i32
    scf.if %2 {
      %c0_63 = arith.constant 0 : index
      %c0_64 = arith.constant 0 : index
      %161 = vector.load %arg1[%c0_63, %c0_64] : memref<16x32xf32, #tpu.memory_space<vmem>>, vector<16x32xf32>
      %c0_65 = arith.constant 0 : index
      %c0_66 = arith.constant 0 : index
      %162 = vector.load %arg15[%c0_65, %c0_66] : memref<16x32xf32, #tpu.memory_space<vmem>>, vector<16x32xf32>
      tpu.vector_store %arg15[%c0_65, %c0_66], %161 {strides = array<i32>} : memref<16x32xf32, #tpu.memory_space<vmem>>, vector<16x32xf32>,
    } else {
    }
    %c0 = arith.constant 0 : index
    %c0_1 = arith.constant 0 : index
    %3 = vector.load %arg15[%c0, %c0_1] : memref<16x32xf32, #tpu.memory_space<vmem>>, vector<16x32xf32>
    %c0_2 = arith.constant 0 : index
    %c0_3 = arith.constant 0 : index
    %c0_4 = arith.constant 0 : index
    %4 = vector.load %arg2[%c0_2, %c0_3, %c0_4] : memref<1x1x32xf32, #tpu.memory_space<vmem>>, vector<1x1x32xf32>
    %5 = vector.shape_cast %4 : vector<1x1x32xf32> to vector<1x32xf32>
    %c0_5 = arith.constant 0 : index
    %c0_6 = arith.constant 0 : index
    %c0_7 = arith.constant 0 : index
    %6 = vector.load %arg3[%c0_5, %c0_6, %c0_7] : memref<1x1x32xf32, #tpu.memory_space<vmem>>, vector<1x1x32xf32>
    %7 = vector.shape_cast %6 : vector<1x1x32xf32> to vector<1x32xf32>
    %cst = arith.constant dense<0.000000e+00> : vector<16xf32>
    %8 = vector.multi_reduction <add>, %3, %cst [1] : vector<16x32xf32> to vector<16xf32>
    %9 = vector.shape_cast %8 : vector<16xf32> to vector<16x1xf32>
    %cst_8 = arith.constant 3.200000e+01 : f32
    %10 = vector.broadcast %cst_8 : f32 to vector<16x1xf32>
    %11 = arith.divf %9, %10 : vector<16x1xf32>
    %12 = arith.mulf %3, %3 : vector<16x32xf32>
    %cst_9 = arith.constant dense<0.000000e+00> : vector<16xf32>
    %13 = vector.multi_reduction <add>, %12, %cst_9 [1] : vector<16x32xf32> to vector<16xf32>
    %14 = vector.shape_cast %13 : vector<16xf32> to vector<16x1xf32>
    %cst_10 = arith.constant 3.200000e+01 : f32
    %15 = vector.broadcast %cst_10 : f32 to vector<16x1xf32>
    %16 = arith.divf %14, %15 : vector<16x1xf32>
    %17 = arith.mulf %11, %11 : vector<16x1xf32>
    %18 = arith.subf %16, %17 : vector<16x1xf32>
    %19 = vector.broadcast %11 : vector<16x1xf32> to vector<16x32xf32>
    %20 = arith.subf %3, %19 : vector<16x32xf32>
    %cst_11 = arith.constant 9.99999974E-6 : f32
    %21 = vector.broadcast %cst_11 : f32 to vector<16x1xf32>
    %22 = arith.addf %18, %21 : vector<16x1xf32>
    %23 = math.rsqrt %22 : vector<16x1xf32>
    %24 = vector.broadcast %23 : vector<16x1xf32> to vector<16x32xf32>
    %25 = arith.mulf %20, %24 : vector<16x32xf32>
    %26 = vector.broadcast %5 : vector<1x32xf32> to vector<16x32xf32>
    %27 = arith.mulf %25, %26 : vector<16x32xf32>
    %28 = vector.broadcast %7 : vector<1x32xf32> to vector<16x32xf32>
    %29 = arith.addf %27, %28 : vector<16x32xf32>
    %30 = arith.truncf %29 : vector<16x32xf32> to vector<16x32xbf16>
    %c0_12 = arith.constant 0 : index
    %c0_13 = arith.constant 0 : index
    %c0_14 = arith.constant 0 : index
    %31 = vector.load %arg4[%c0_12, %c0_13, %c0_14] : memref<1x32x96xbf16, #tpu.memory_space<vmem>>, vector<1x32x96xbf16>
    %32 = vector.shape_cast %31 : vector<1x32x96xbf16> to vector<32x96xbf16>
    %cst_15 = arith.constant dense<0.000000e+00> : vector<16x96xf32>
    %33 = tpu.matmul %30, %32, %cst_15 {dimension_numbers = #tpu.dot_dimension_numbers<[1], [0], [0], [1], [0, 0, 1, 1], [], []>} : vector<16x32xbf16>, vector<32x96xbf16>, vector<16x96xf32> -> vector<16x96xf32>
    %c0_16 = arith.constant 0 : index
    %c0_17 = arith.constant 0 : index
    %c0_18 = arith.constant 0 : index
    %34 = vector.load %arg5[%c0_16, %c0_17, %c0_18] : memref<1x1x96xf32, #tpu.memory_space<vmem>>, vector<1x1x96xf32>
    %35 = vector.shape_cast %34 : vector<1x1x96xf32> to vector<1x96xf32>
    %36 = vector.broadcast %35 : vector<1x96xf32> to vector<16x96xf32>
    %37 = arith.addf %33, %36 : vector<16x96xf32>
    %38 = vector.extract_strided_slice %37 {offsets = [0, 0], sizes = [16, 8], strides = [1, 1]} : vector<16x96xf32> to vector<16x8xf32>
    %39 = vector.shape_cast %38 : vector<16x8xf32> to vector<2x8x8xf32>
    %40 = vector.extract_strided_slice %37 {offsets = [0, 8], sizes = [16, 8], strides = [1, 1]} : vector<16x96xf32> to vector<16x8xf32>
    %41 = vector.shape_cast %40 : vector<16x8xf32> to vector<2x8x8xf32>
    %42 = vector.extract_strided_slice %37 {offsets = [0, 16], sizes = [16, 8], strides = [1, 1]} : vector<16x96xf32> to vector<16x8xf32>
    %43 = vector.shape_cast %42 : vector<16x8xf32> to vector<2x8x8xf32>
    %44 = vector.extract_strided_slice %37 {offsets = [0, 24], sizes = [16, 8], strides = [1, 1]} : vector<16x96xf32> to vector<16x8xf32>
    %45 = vector.shape_cast %44 : vector<16x8xf32> to vector<2x8x8xf32>
    %46 = tpu.concatenate %39, %41, %43, %45 in 0 : vector<2x8x8xf32>, vector<2x8x8xf32>, vector<2x8x8xf32>, vector<2x8x8xf32> -> vector<8x8x8xf32>
    %47 = arith.truncf %46 : vector<8x8x8xf32> to vector<8x8x8xbf16>
    %48 = vector.extract_strided_slice %37 {offsets = [0, 32], sizes = [16, 8], strides = [1, 1]} : vector<16x96xf32> to vector<16x8xf32>
    %49 = vector.shape_cast %48 : vector<16x8xf32> to vector<2x8x8xf32>
    %50 = vector.extract_strided_slice %37 {offsets = [0, 40], sizes = [16, 8], strides = [1, 1]} : vector<16x96xf32> to vector<16x8xf32>
    %51 = vector.shape_cast %50 : vector<16x8xf32> to vector<2x8x8xf32>
    %52 = vector.extract_strided_slice %37 {offsets = [0, 48], sizes = [16, 8], strides = [1, 1]} : vector<16x96xf32> to vector<16x8xf32>
    %53 = vector.shape_cast %52 : vector<16x8xf32> to vector<2x8x8xf32>
    %54 = vector.extract_strided_slice %37 {offsets = [0, 56], sizes = [16, 8], strides = [1, 1]} : vector<16x96xf32> to vector<16x8xf32>
    %55 = vector.shape_cast %54 : vector<16x8xf32> to vector<2x8x8xf32>
    %56 = tpu.concatenate %49, %51, %53, %55 in 0 : vector<2x8x8xf32>, vector<2x8x8xf32>, vector<2x8x8xf32>, vector<2x8x8xf32> -> vector<8x8x8xf32>
    %57 = arith.truncf %56 : vector<8x8x8xf32> to vector<8x8x8xbf16>
    %58 = vector.extract_strided_slice %37 {offsets = [0, 64], sizes = [16, 8], strides = [1, 1]} : vector<16x96xf32> to vector<16x8xf32>
    %59 = vector.shape_cast %58 : vector<16x8xf32> to vector<2x8x8xf32>
    %60 = vector.extract_strided_slice %37 {offsets = [0, 72], sizes = [16, 8], strides = [1, 1]} : vector<16x96xf32> to vector<16x8xf32>
    %61 = vector.shape_cast %60 : vector<16x8xf32> to vector<2x8x8xf32>
    %62 = vector.extract_strided_slice %37 {offsets = [0, 80], sizes = [16, 8], strides = [1, 1]} : vector<16x96xf32> to vector<16x8xf32>
    %63 = vector.shape_cast %62 : vector<16x8xf32> to vector<2x8x8xf32>
    %64 = vector.extract_strided_slice %37 {offsets = [0, 88], sizes = [16, 8], strides = [1, 1]} : vector<16x96xf32> to vector<16x8xf32>
    %65 = vector.shape_cast %64 : vector<16x8xf32> to vector<2x8x8xf32>
    %66 = tpu.concatenate %59, %61, %63, %65 in 0 : vector<2x8x8xf32>, vector<2x8x8xf32>, vector<2x8x8xf32>, vector<2x8x8xf32> -> vector<8x8x8xf32>
    %67 = arith.truncf %66 : vector<8x8x8xf32> to vector<8x8x8xbf16>
    "tpu.trace_start"() <{level = 10 : i32, message = "bqd,bkd->bqk"}> : () -> ()
    %cst_19 = arith.constant dense<0.000000e+00> : vector<8x8x8xf32>
    %68 = tpu.matmul %47, %57, %cst_19 {dimension_numbers = #tpu.dot_dimension_numbers<[2], [2], [1], [1], [0, 0, 0, 1, 1, 1], [0], [0]>} : vector<8x8x8xbf16>, vector<8x8x8xbf16>, vector<8x8x8xf32> -> vector<8x8x8xf32>
    "tpu.trace_stop"() : () -> ()
    %cst_20 = arith.constant 0.353553385 : f32
    %69 = vector.broadcast %cst_20 : f32 to vector<8x8x8xf32>
    %70 = arith.mulf %68, %69 : vector<8x8x8xf32>
    %cst_21 = arith.constant dense<0xFF800000> : vector<8x8xf32>
    %71 = vector.multi_reduction <maximumf>, %70, %cst_21 [2] : vector<8x8x8xf32> to vector<8x8xf32>
    %72 = vector.shape_cast %71 : vector<8x8xf32> to vector<8x8x1xf32>
    %73 = vector.broadcast %72 : vector<8x8x1xf32> to vector<8x8x8xf32>
    %74 = arith.subf %70, %73 : vector<8x8x8xf32>
    %75 = math.exp %74 : vector<8x8x8xf32>
    %cst_22 = arith.constant dense<0.000000e+00> : vector<8x8xf32>
    %76 = vector.multi_reduction <add>, %75, %cst_22 [2] : vector<8x8x8xf32> to vector<8x8xf32>
    %77 = vector.shape_cast %76 : vector<8x8xf32> to vector<8x8x1xf32>
    %78 = tpu.reciprocal %77 {approx = true} : vector<8x8x1xf32> -> vector<8x8x1xf32>
    %79 = vector.broadcast %78 : vector<8x8x1xf32> to vector<8x8x8xf32>
    %80 = arith.mulf %75, %79 : vector<8x8x8xf32>
    %81 = arith.truncf %80 : vector<8x8x8xf32> to vector<8x8x8xbf16>
    "tpu.trace_start"() <{level = 10 : i32, message = "bqk,bkd->bqd"}> : () -> ()
    %cst_23 = arith.constant dense<0.000000e+00> : vector<8x8x8xf32>
    %82 = tpu.matmul %81, %67, %cst_23 {dimension_numbers = #tpu.dot_dimension_numbers<[2], [1], [1], [2], [0, 0, 0, 1, 1, 2], [0], [0]>} : vector<8x8x8xbf16>, vector<8x8x8xbf16>, vector<8x8x8xf32> -> vector<8x8x8xf32>
    "tpu.trace_stop"() : () -> ()
    %83 = vector.extract_strided_slice %82 {offsets = [0, 0, 0], sizes = [2, 8, 8], strides = [1, 1, 1]} : vector<8x8x8xf32> to vector<2x8x8xf32>
    %84 = vector.shape_cast %83 : vector<2x8x8xf32> to vector<16x8xf32>
    %85 = vector.extract_strided_slice %82 {offsets = [2, 0, 0], sizes = [2, 8, 8], strides = [1, 1, 1]} : vector<8x8x8xf32> to vector<2x8x8xf32>
    %86 = vector.shape_cast %85 : vector<2x8x8xf32> to vector<16x8xf32>
    %87 = vector.extract_strided_slice %82 {offsets = [4, 0, 0], sizes = [2, 8, 8], strides = [1, 1, 1]} : vector<8x8x8xf32> to vector<2x8x8xf32>
    %88 = vector.shape_cast %87 : vector<2x8x8xf32> to vector<16x8xf32>
    %89 = vector.extract_strided_slice %82 {offsets = [6, 0, 0], sizes = [2, 8, 8], strides = [1, 1, 1]} : vector<8x8x8xf32> to vector<2x8x8xf32>
    %90 = vector.shape_cast %89 : vector<2x8x8xf32> to vector<16x8xf32>
    %91 = tpu.concatenate %84, %86, %88, %90 in 1 : vector<16x8xf32>, vector<16x8xf32>, vector<16x8xf32>, vector<16x8xf32> -> vector<16x32xf32>
    %92 = arith.truncf %91 : vector<16x32xf32> to vector<16x32xbf16>
    %c0_24 = arith.constant 0 : index
    %c0_25 = arith.constant 0 : index
    %c0_26 = arith.constant 0 : index
    %93 = vector.load %arg6[%c0_24, %c0_25, %c0_26] : memref<1x32x32xbf16, #tpu.memory_space<vmem>>, vector<1x32x32xbf16>
    %94 = vector.shape_cast %93 : vector<1x32x32xbf16> to vector<32x32xbf16>
    %cst_27 = arith.constant dense<0.000000e+00> : vector<16x32xf32>
    %95 = tpu.matmul %92, %94, %cst_27 {dimension_numbers = #tpu.dot_dimension_numbers<[1], [0], [0], [1], [0, 0, 1, 1], [], []>} : vector<16x32xbf16>, vector<32x32xbf16>, vector<16x32xf32> -> vector<16x32xf32>
    %96 = arith.addf %3, %95 : vector<16x32xf32>
    %c0_28 = arith.constant 0 : index
    %c0_29 = arith.constant 0 : index
    %c0_30 = arith.constant 0 : index
    %97 = vector.load %arg7[%c0_28, %c0_29, %c0_30] : memref<1x1x32xf32, #tpu.memory_space<vmem>>, vector<1x1x32xf32>
    %98 = vector.shape_cast %97 : vector<1x1x32xf32> to vector<1x32xf32>
    %99 = vector.broadcast %98 : vector<1x32xf32> to vector<16x32xf32>
    %100 = arith.addf %96, %99 : vector<16x32xf32>
    %c0_31 = arith.constant 0 : index
    %c0_32 = arith.constant 0 : index
    %c0_33 = arith.constant 0 : index
    %101 = vector.load %arg8[%c0_31, %c0_32, %c0_33] : memref<1x1x32xf32, #tpu.memory_space<vmem>>, vector<1x1x32xf32>
    %102 = vector.shape_cast %101 : vector<1x1x32xf32> to vector<1x32xf32>
    %c0_34 = arith.constant 0 : index
    %c0_35 = arith.constant 0 : index
    %c0_36 = arith.constant 0 : index
    %103 = vector.load %arg9[%c0_34, %c0_35, %c0_36] : memref<1x1x32xf32, #tpu.memory_space<vmem>>, vector<1x1x32xf32>
    %104 = vector.shape_cast %103 : vector<1x1x32xf32> to vector<1x32xf32>
    %cst_37 = arith.constant dense<0.000000e+00> : vector<16xf32>
    %105 = vector.multi_reduction <add>, %100, %cst_37 [1] : vector<16x32xf32> to vector<16xf32>
    %106 = vector.shape_cast %105 : vector<16xf32> to vector<16x1xf32>
    %cst_38 = arith.constant 3.200000e+01 : f32
    %107 = vector.broadcast %cst_38 : f32 to vector<16x1xf32>
    %108 = arith.divf %106, %107 : vector<16x1xf32>
    %109 = arith.mulf %100, %100 : vector<16x32xf32>
    %cst_39 = arith.constant dense<0.000000e+00> : vector<16xf32>
    %110 = vector.multi_reduction <add>, %109, %cst_39 [1] : vector<16x32xf32> to vector<16xf32>
    %111 = vector.shape_cast %110 : vector<16xf32> to vector<16x1xf32>
    %cst_40 = arith.constant 3.200000e+01 : f32
    %112 = vector.broadcast %cst_40 : f32 to vector<16x1xf32>
    %113 = arith.divf %111, %112 : vector<16x1xf32>
    %114 = arith.mulf %108, %108 : vector<16x1xf32>
    %115 = arith.subf %113, %114 : vector<16x1xf32>
    %116 = vector.broadcast %108 : vector<16x1xf32> to vector<16x32xf32>
    %117 = arith.subf %100, %116 : vector<16x32xf32>
    %cst_41 = arith.constant 9.99999974E-6 : f32
    %118 = vector.broadcast %cst_41 : f32 to vector<16x1xf32>
    %119 = arith.addf %115, %118 : vector<16x1xf32>
    %120 = math.rsqrt %119 : vector<16x1xf32>
    %121 = vector.broadcast %120 : vector<16x1xf32> to vector<16x32xf32>
    %122 = arith.mulf %117, %121 : vector<16x32xf32>
    %123 = vector.broadcast %102 : vector<1x32xf32> to vector<16x32xf32>
    %124 = arith.mulf %122, %123 : vector<16x32xf32>
    %125 = vector.broadcast %104 : vector<1x32xf32> to vector<16x32xf32>
    %126 = arith.addf %124, %125 : vector<16x32xf32>
    %127 = arith.truncf %126 : vector<16x32xf32> to vector<16x32xbf16>
    %c0_42 = arith.constant 0 : index
    %c0_43 = arith.constant 0 : index
    %c0_44 = arith.constant 0 : index
    %128 = vector.load %arg10[%c0_42, %c0_43, %c0_44] : memref<1x32x128xbf16, #tpu.memory_space<vmem>>, vector<1x32x128xbf16>
    %129 = vector.shape_cast %128 : vector<1x32x128xbf16> to vector<32x128xbf16>
    %cst_45 = arith.constant dense<0.000000e+00> : vector<16x128xf32>
    %130 = tpu.matmul %127, %129, %cst_45 {dimension_numbers = #tpu.dot_dimension_numbers<[1], [0], [0], [1], [0, 0, 1, 1], [], []>} : vector<16x32xbf16>, vector<32x128xbf16>, vector<16x128xf32> -> vector<16x128xf32>
    %c0_46 = arith.constant 0 : index
    %c0_47 = arith.constant 0 : index
    %c0_48 = arith.constant 0 : index
    %131 = vector.load %arg11[%c0_46, %c0_47, %c0_48] : memref<1x1x128xf32, #tpu.memory_space<vmem>>, vector<1x1x128xf32>
    %132 = vector.shape_cast %131 : vector<1x1x128xf32> to vector<1x128xf32>
    %133 = vector.broadcast %132 : vector<1x128xf32> to vector<16x128xf32>
    %134 = arith.addf %130, %133 : vector<16x128xf32>
    %cst_49 = arith.constant 5.000000e-01 : f32
    %135 = vector.broadcast %cst_49 : f32 to vector<16x128xf32>
    %136 = arith.mulf %135, %134 : vector<16x128xf32>
    %cst_50 = arith.constant 4.471500e-02 : f32
    %137 = vector.broadcast %cst_50 : f32 to vector<16x128xf32>
    %138 = arith.mulf %137, %134 : vector<16x128xf32>
    %139 = arith.mulf %138, %134 : vector<16x128xf32>
    %140 = arith.mulf %139, %134 : vector<16x128xf32>
    %141 = arith.addf %134, %140 : vector<16x128xf32>
    %cst_51 = arith.constant 0.797884583 : f32
    %142 = vector.broadcast %cst_51 : f32 to vector<16x128xf32>
    %143 = arith.mulf %142, %141 : vector<16x128xf32>
    %144 = math.tanh %143 : vector<16x128xf32>
    %cst_52 = arith.constant 1.000000e+00 : f32
    %145 = vector.broadcast %cst_52 : f32 to vector<16x128xf32>
    %146 = arith.addf %145, %144 : vector<16x128xf32>
    %147 = arith.mulf %136, %146 : vector<16x128xf32>
    %148 = arith.truncf %147 : vector<16x128xf32> to vector<16x128xbf16>
    %c0_53 = arith.constant 0 : index
    %c0_54 = arith.constant 0 : index
    %c0_55 = arith.constant 0 : index
    %149 = vector.load %arg12[%c0_53, %c0_54, %c0_55] : memref<1x128x32xbf16, #tpu.memory_space<vmem>>, vector<1x128x32xbf16>
    %150 = vector.shape_cast %149 : vector<1x128x32xbf16> to vector<128x32xbf16>
    %cst_56 = arith.constant dense<0.000000e+00> : vector<16x32xf32>
    %151 = tpu.matmul %148, %150, %cst_56 {dimension_numbers = #tpu.dot_dimension_numbers<[1], [0], [0], [1], [0, 0, 1, 1], [], []>} : vector<16x128xbf16>, vector<128x32xbf16>, vector<16x32xf32> -> vector<16x32xf32>
    %c0_57 = arith.constant 0 : index
    %c0_58 = arith.constant 0 : index
    %c0_59 = arith.constant 0 : index
    %152 = vector.load %arg13[%c0_57, %c0_58, %c0_59] : memref<1x1x32xf32, #tpu.memory_space<vmem>>, vector<1x1x32xf32>
    %153 = vector.shape_cast %152 : vector<1x1x32xf32> to vector<1x32xf32>
    %154 = vector.broadcast %153 : vector<1x32xf32> to vector<16x32xf32>
    %155 = arith.addf %151, %154 : vector<16x32xf32>
    %156 = arith.addf %100, %155 : vector<16x32xf32>
    %c0_60 = arith.constant 0 : index
    %c0_61 = arith.constant 0 : index
    %157 = vector.load %arg15[%c0_60, %c0_61] : memref<16x32xf32, #tpu.memory_space<vmem>>, vector<16x32xf32>
    tpu.vector_store %arg15[%c0_60, %c0_61], %156 {strides = array<i32>} : memref<16x32xf32, #tpu.memory_space<vmem>>, vector<16x32xf32>,
    %c1_i32 = arith.constant 1 : i32
    %158 = arith.cmpi eq, %arg0, %c1_i32 : i32
    %159 = arith.extui %158 : i1 to i32
    %c0_i32_62 = arith.constant 0 : i32
    %160 = arith.cmpi ne, %159, %c0_i32_62 : i32
    scf.if %160 {
      %c0_63 = arith.constant 0 : index
      %c0_64 = arith.constant 0 : index
      %161 = vector.load %arg14[%c0_63, %c0_64] : memref<16x32xf32, #tpu.memory_space<vmem>>, vector<16x32xf32>
      tpu.vector_store %arg14[%c0_63, %c0_64], %156 {strides = array<i32>} : memref<16x32xf32, #tpu.memory_space<vmem>>, vector<16x32xf32>,
    } else {
    }
    return
  }
  func.func @transform_0(%arg0: i32) -> (i32, i32) {
    %c0_i32 = arith.constant 0 : i32
    %c0_i32_0 = arith.constant 0 : i32
    %c0_i32_1 = arith.constant 0 : i32
    return %c0_i32, %c0_i32_0 : i32, i32
  }
  func.func @transform_1(%arg0: i32) -> (i32, i32, i32) {
    %c0_i32 = arith.constant 0 : i32
    %c0_i32_0 = arith.constant 0 : i32
    %c0_i32_1 = arith.constant 0 : i32
    return %arg0, %c0_i32, %c0_i32_0 : i32, i32, i32
  }
  func.func @transform_2(%arg0: i32) -> (i32, i32, i32) {
    %c0_i32 = arith.constant 0 : i32
    %c0_i32_0 = arith.constant 0 : i32
    %c0_i32_1 = arith.constant 0 : i32
    return %arg0, %c0_i32, %c0_i32_0 : i32, i32, i32
  }
  func.func @transform_3(%arg0: i32) -> (i32, i32, i32) {
    %c0_i32 = arith.constant 0 : i32
    %c0_i32_0 = arith.constant 0 : i32
    %c0_i32_1 = arith.constant 0 : i32
    return %arg0, %c0_i32, %c0_i32_0 : i32, i32, i32
  }
  func.func @transform_4(%arg0: i32) -> (i32, i32, i32) {
    %c0_i32 = arith.constant 0 : i32
    %c0_i32_0 = arith.constant 0 : i32
    %c0_i32_1 = arith.constant 0 : i32
    return %arg0, %c0_i32, %c0_i32_0 : i32, i32, i32
  }
  func.func @transform_5(%arg0: i32) -> (i32, i32, i32) {
    %c0_i32 = arith.constant 0 : i32
    %c0_i32_0 = arith.constant 0 : i32
    %c0_i32_1 = arith.constant 0 : i32
    return %arg0, %c0_i32, %c0_i32_0 : i32, i32, i32
  }
  func.func @transform_6(%arg0: i32) -> (i32, i32, i32) {
    %c0_i32 = arith.constant 0 : i32
    %c0_i32_0 = arith.constant 0 : i32
    %c0_i32_1 = arith.constant 0 : i32
    return %arg0, %c0_i32, %c0_i32_0 : i32, i32, i32
  }
  func.func @transform_7(%arg0: i32) -> (i32, i32, i32) {
    %c0_i32 = arith.constant 0 : i32
    %c0_i32_0 = arith.constant 0 : i32
    %c0_i32_1 = arith.constant 0 : i32
    return %arg0, %c0_i32, %c0_i32_0 : i32, i32, i32
  }
  func.func @transform_8(%arg0: i32) -> (i32, i32, i32) {
    %c0_i32 = arith.constant 0 : i32
    %c0_i32_0 = arith.constant 0 : i32
    %c0_i32_1 = arith.constant 0 : i32
    return %arg0, %c0_i32, %c0_i32_0 : i32, i32, i32
  }
  func.func @transform_9(%arg0: i32) -> (i32, i32, i32) {
    %c0_i32 = arith.constant 0 : i32
    %c0_i32_0 = arith.constant 0 : i32
    %c0_i32_1 = arith.constant 0 : i32
    return %arg0, %c0_i32, %c0_i32_0 : i32, i32, i32
  }
  func.func @transform_10(%arg0: i32) -> (i32, i32, i32) {
    %c0_i32 = arith.constant 0 : i32
    %c0_i32_0 = arith.constant 0 : i32
    %c0_i32_1 = arith.constant 0 : i32
    return %arg0, %c0_i32, %c0_i32_0 : i32, i32, i32
  }
  func.func @transform_11(%arg0: i32) -> (i32, i32, i32) {
    %c0_i32 = arith.constant 0 : i32
    %c0_i32_0 = arith.constant 0 : i32
    %c0_i32_1 = arith.constant 0 : i32
    return %arg0, %c0_i32, %c0_i32_0 : i32, i32, i32
  }
  func.func @transform_12(%arg0: i32) -> (i32, i32, i32) {
    %c0_i32 = arith.constant 0 : i32
    %c0_i32_0 = arith.constant 0 : i32
    %c0_i32_1 = arith.constant 0 : i32
    return %arg0, %c0_i32, %c0_i32_0 : i32, i32, i32
  }
  func.func @transform_13(%arg0: i32) -> (i32, i32) {
    %c0_i32 = arith.constant 0 : i32
    %c0_i32_0 = arith.constant 0 : i32
    %c0_i32_1 = arith.constant 0 : i32
    return %c0_i32, %c0_i32_0 : i32, i32
  }
}

</mosaic_0001>

<bundles_post_ra>
// kernel: _lambda_.1
= control target key start
LH: loop header
LB: loop body
LE: loop exit
PB: predicated region body
PF: predicated region fallthrough
CT: control target
= control target key end

     0   :  { %s3490_s0 = inlined_call_operand.vmem [shape: f32[16,32], index: 0, kind: input, shape index: {}]   ;;  %s3491_s1 = inlined_call_operand.vmem [shape: f32[2,1,32], index: 1, kind: input, shape index: {}, may-alias: {1,7}]   ;;  %s3492_s2 = inlined_call_operand.vmem [shape: f32[2,1,32], index: 2, kind: input, shape index: {}, may-alias: {2,8}]   ;;  %s3493_s3 = inlined_call_operand.hbm [shape: bf16[2,32,96], index: 3, kind: input, shape index: {}]   ;;  %s3494_s4 = inlined_call_operand.vmem [shape: f32[2,1,96], index: 4, kind: input, shape index: {}]   ;;  %s3495_s5 = inlined_call_operand.hbm [shape: bf16[2,32,32], index: 5, kind: input, shape index: {}]   ;;  %s3496_s6 = inlined_call_operand.vmem [shape: f32[2,1,32], index: 6, kind: input, shape index: {}]   ;;  %s3497_s7 = inlined_call_operand.vmem [shape: f32[2,1,32], index: 7, kind: input, shape index: {}, may-alias: {1,7}]   ;;  %s3498_s8 = inlined_call_operand.vmem [shape: f32[2,1,32], index: 8, kind: input, shape index: {}, may-alias: {2,8}]   ;;  %s3499_s9 = inlined_call_operand.vmem [shape: bf16[2,32,128], index: 9, kind: input, shape index: {}]   ;;  %s3500_s10 = inlined_call_operand.vmem [shape: f32[2,1,128], index: 10, kind: input, shape index: {}]   ;;  %s3501_s11 = inlined_call_operand.hbm [shape: bf16[2,128,32], index: 11, kind: input, shape index: {}]   ;;  %s3502_s12 = inlined_call_operand.vmem [shape: f32[2,1,32], index: 12, kind: input, shape index: {}]   ;;  %s3503_s13 = inlined_call_operand.hbm [shape: f32[16,32], index: 13, kind: output, shape index: {}]  }
   0x1   :  { %3516 = sst [smem:[#allocation16_spill]] %s3490_s0 }
   0x2   :  { %3517 = sst [smem:[#allocation17_spill]] %s3493_s3 }
   0x3   :  { %3518 = sst [smem:[#allocation18_spill]] %s3495_s5 }
   0x4   :  { %3519 = sst [smem:[#allocation19_spill]] %s3501_s11 }
   0x5   :  { %3520 = sst [smem:[#allocation20_spill]] %s3502_s12 }
   0x6   :  { %3521 = sst [smem:[#allocation21_spill]] %s3503_s13 }
   0x7   :  { %18 = vsyncpa [#allocation4], 0 }
   0x8   :  { %20 = vsyncpa [#allocation4 + $0x1], 0 }
   0x9   :  { %21 = vsyncpa [#allocation7], 0 }
   0xa   :  { %23 = vsyncpa [#allocation7 + $0x1], 0 }
   0xb   :  { %24 = vsyncpa [#allocation5], 0  ;;  %s2906_s25 = smov 0   ;;  %s2908_s26 = smov 0  }
   0xc   :  { %s2910_s27 = smov 0   ;;  %s2912_s28 = smov 0  }
   0xd LB: > { %3522 = sst [smem:[#allocation13_spill]] %s2813_s27  ;;  %s2925_s29 = sadd.s32 4294967295, %s2817_s28   ;;  %s2817_s28 = sphi %s2912_s28, %s3548_s28   ;;  %s2813_s27 = sphi %s2910_s27, %s3550_s27   ;;  %s2809_s26 = sphi %s2908_s26, %s3552_s26   ;;  %s2805_s25 = sphi %s2906_s25, %s3551_s25  }
   0xe   : > { %s2928_s30 = sadd.s32 1, %s2817_s28   ;;  %s110_s15 = sadd.s32 1, %s2813_s27 }
   0xf   : > { %3523 = sst [smem:[#allocation14_spill]] %s2928_s30  ;;  %s107_s14 = ssub.s32 %s2817_s28, %s2928_s30 }
  0x10   : > { %p108_p0 = scmp.eq.s32.totalorder %s107_s14, 0  ;;  %p117_p1 = scmp.ne.s32.totalorder %s2813_s27, %s2809_s26 }
  0x11   : > { %p118_p2 = scmp.eq.s32.totalorder %s2817_s28, 0  ;;  %p123_p3 = scmp.ne.s32.totalorder %s2809_s26, %s2805_s25 }
  0x12   : > { %s2938_s16 = scalar_select %p108_p0, %s2813_s27, %s110_s15  }
  0x13   : > { %p119_p4 = por %p118_p2, %p117_p1  ;;  %p124_p5 = scmp.eq.s32.totalorder %s2925_s29, 0 }
  0x14   : > { %3524 = sst [smem:[#allocation15_spill]] %s2938_s16  ;;  %p2522_p6 = scmp.lt.s32.totalorder %s2817_s28, 2 }
  0x15   : > { %p2942_p7 = por %p124_p5, %p123_p3  ;;  %s2947_s18 = sand.u32 1, %s2813_s27  }
  0x16   : > { %s3505_s19 = sshll.u32 %s2947_s18, 4  ;;  %s3506_s20 = sshll.u32 %s2817_s28, 8 }
  0x17   : > { %s3525_s17 = scalar_select %p2942_p7, 1, 0 }
  0x18   : > { %p2951_p8 = pnand %p2522_p6, %p119_p4  ;;  %s444_s22 = sand.u32 1, %s2817_s28  }
  0x19   : > { %s3527_s5 = sld [smem:[#allocation18_spill]]  ;;  %s448_s14 = scalar_lea.vmem [#allocation6], %s3505_s19 }
  0x1a   : > { %s455_s15 = sshll.u32 %s448_s14, 4  ;;  %s2969_s16 = scalar_lea.sflag [#allocation7], %s444_s22  ;;  %s2966_s15 = int_to_ptr.vmem [resolvable:$true] %s455_s15 }
  0x1b   : > { %p2975_p12 = pneg %p2951_p8 }
  0x1f   : > { %s2961_s25 = scalar_lea.hbm %s3527_s5, %s3506_s20  ;;  %s2664_s14 = scalar_lea.hbm %s3527_s5, 512 }
  0x20   : > { %s2659_s27 = scalar_lea.hbm %s2961_s25, 256  ;;  %p2665_p1 = scmp.lt.u32.totalorder %s2961_s25, %s3527_s5 }
  0x21   : > { %p2660_p11 = scmp.ne.s32.totalorder %s2961_s25, %s2659_s27  ;;  %p2666_p2 = scmp.lt.u32.totalorder %s2664_s14, %s2659_s27 }
  0x22   : > { %p2668_p4 = scmp.lt.u32.totalorder %s2659_s27, %s2961_s25 }
  0x23   : > { %p2662_p13 = pnand %p2975_p12, %p2660_p11  ;;  %p2667_p3 = por %p2666_p2, %p2665_p1 }
  0x25   : > { %p2663_p0 = pneg %p2662_p13  ;;  %p2669_p5 = por %p2668_p4, %p2667_p3 }
  0x27   : > { %p2670_p6 = pnand %p2669_p5, %p2663_p0 }
  0x29   : > { %2673 = shalt.err (!%p2670_p6)
}
  0x2a   : > { %s2674_s22 = scalar_lea.vmem %s2966_s15, 256  ;;  %s2819_s19 = smov [#allocation6]  }
  0x2b   : > { %p2675_p11 = scmp.ne.s32.totalorder %s2966_s15, %s2674_s22  ;;  %s2679_s24 = sshll.u32 %s2819_s19, 4  ;;  %s2680_s24 = int_to_ptr.vmem [resolvable:$false] %s2679_s24 }
  0x2c   : > { %s2681_s30 = scalar_lea.vmem %s2680_s24, 512  ;;  %p2682_p10 = scmp.lt.s32.totalorder %s2966_s15, %s2680_s24 }
  0x2d   : > { %p2677_p13 = pnand %p2675_p11, %p2975_p12  ;;  %p2683_p7 = scmp.lt.s32.totalorder %s2681_s30, %s2674_s22 }
  0x2f   : > { %p2678_p9 = pneg %p2677_p13  ;;  %p2684_p1 = por %p2683_p7, %p2682_p10 }
  0x31   : > { %p2685_p2 = pnand %p2684_p1, %p2678_p9 }
  0x33   : > { %2688 = shalt.err (!%p2685_p2)
}
  0x34   : > { %s3512_s27 = smov 64   ;;  %s3514_s20 = smov 4  }
  0x35   : > { %2518 = dma.hbm_to_vmem [thread:$0]  (!%p2951_p8), %s2961_s25, 256, %s2966_s15, %s2969_s16, %s3512_s27, %s3512_s27, %s3514_s20  }
  0x36   : > { %p3529_p7 = scmp.lt.s32.totalorder %s2817_s28, 3  ;;  %p3530_p9 = scmp.ge.s32.totalorder %s2817_s28, 1 }
  0x37   : > { %s3532_s22 = sshll.u32 %s2817_s28, 8  ;;  %s3533_s3 = sld [smem:[#allocation17_spill]] }
  0x38   : > { %p3006_p10 = pnand %p3530_p9, %p3529_p7  ;;  %s3534_s5 = sshll.u32 %s2947_s18, 4 }
  0x39   : > { %s421_s13 = scalar_lea.vmem [#allocation3], %s3534_s5  ;;  %s2252_s25 = sshll.u32 %s2947_s18, 6 }
  0x3a   : > { %s3531_s14 = scalar_select %p3006_p10, 1, 0 }
  0x3b   : > { %s428_s0 = sshll.u32 %s421_s13, 4  ;;  %s418_s15 = scalar_lea.sflag [#allocation4], %s2947_s18  ;;  %s3020_s0 = int_to_ptr.vmem [resolvable:$true] %s428_s0 }
  0x3d   : > { %s3015_s30 = scalar_lea.hbm %s3533_s3, %s3532_s22  ;;  %s2694_s22 = scalar_lea.hbm %s3533_s3, 512 }
  0x3e   : > { %s2689_s27 = scalar_lea.hbm %s3015_s30, 256  ;;  %p2695_p5 = scmp.lt.u32.totalorder %s3015_s30, %s3533_s3 }
  0x3f   : > { %p2690_p0 = scmp.ne.s32.totalorder %s3015_s30, %s2689_s27  ;;  %p2696_p6 = scmp.lt.u32.totalorder %s2694_s22, %s2689_s27 }
  0x40   : > { %p2698_p13 = scmp.lt.u32.totalorder %s2689_s27, %s3015_s30 }
  0x41   : > { %p2692_p3 = pnand %p2690_p0, %p2975_p12  ;;  %p2697_p11 = por %p2696_p6, %p2695_p5 }
  0x43   : > { %p2693_p4 = pneg %p2692_p3  ;;  %p2699_p1 = por %p2698_p13, %p2697_p11 }
  0x45   : > { %p2700_p2 = pnand %p2699_p1, %p2693_p4 }
  0x47   : > { %2703 = shalt.err (!%p2700_p2)
}
  0x48   : > { %s2704_s5 = scalar_lea.vmem %s3020_s0, 256  ;;  %s2822_s13 = smov [#allocation3]  }
  0x49   : > { %p2705_p7 = scmp.ne.s32.totalorder %s3020_s0, %s2704_s5  ;;  %s2709_s20 = sshll.u32 %s2822_s13, 4  ;;  %s2710_s20 = int_to_ptr.vmem [resolvable:$false] %s2709_s20 }
  0x4a   : > { %s2711_s12 = scalar_lea.vmem %s2710_s20, 512  ;;  %p2712_p3 = scmp.lt.s32.totalorder %s3020_s0, %s2710_s20 }
  0x4b   : > { %p2707_p9 = pnand %p2705_p7, %p2975_p12  ;;  %p2713_p10 = scmp.lt.s32.totalorder %s2711_s12, %s2704_s5 }
  0x4d   : > { %p2708_p0 = pneg %p2707_p9  ;;  %p2714_p5 = por %p2713_p10, %p2712_p3 }
  0x4f   : > { %p2715_p6 = pnand %p2714_p5, %p2708_p0 }
  0x51   : > { %2718 = shalt.err (!%p2715_p6)
}
  0x52   : > { %s3535_s27 = smov 4   ;;  %s3536_s19 = smov 64  }
  0x53   : > { %2515 = dma.hbm_to_vmem [thread:$0]  (!%p2951_p8), %s3015_s30, 256, %s3020_s0, %s418_s15, %s3536_s19, %s3536_s19, %s3535_s27  }
  0x54   : > { %s2310_s22 = sshll.u32 %s2817_s28, 10  ;;  %s501_s24 = scalar_lea.vmem [#allocation8], %s2252_s25 }
  0x55   : > { %s508_s5 = sshll.u32 %s501_s24, 4  ;;  %s3537_s11 = sld [smem:[#allocation19_spill]]  ;;  %s3057_s5 = int_to_ptr.vmem [resolvable:$true] %s508_s5 }
  0x5b   : > { %s3055_s12 = scalar_lea.hbm %s3537_s11, %s2310_s22  ;;  %s2724_s18 = scalar_lea.hbm %s3537_s11, 2048 }
  0x5c   : > { %s2719_s3 = scalar_lea.hbm %s3055_s12, 1024  ;;  %p2725_p13 = scmp.lt.u32.totalorder %s3055_s12, %s3537_s11 }
  0x5d   : > { %p2720_p10 = scmp.ne.s32.totalorder %s3055_s12, %s2719_s3  ;;  %p2726_p1 = scmp.lt.u32.totalorder %s2724_s18, %s2719_s3 }
  0x5e   : > { %p2728_p7 = scmp.lt.u32.totalorder %s2719_s3, %s3055_s12 }
  0x5f   : > { %p2722_p4 = pnand %p2720_p10, %p2975_p12  ;;  %p2727_p2 = por %p2726_p1, %p2725_p13 }
  0x61   : > { %p2723_p11 = pneg %p2722_p4  ;;  %p2729_p9 = por %p2728_p7, %p2727_p2 }
  0x63   : > { %p2730_p0 = pnand %p2729_p9, %p2723_p11 }
  0x65   : > { %2733 = shalt.err (!%p2730_p0)
}
  0x66   : > { %s2734_s15 = scalar_lea.vmem %s3057_s5, 1024  ;;  %s2823_s22 = smov [#allocation8]  }
  0x67   : > { %p2735_p3 = scmp.ne.s32.totalorder %s3057_s5, %s2734_s15  ;;  %s2739_s24 = sshll.u32 %s2823_s22, 4  ;;  %s2740_s24 = int_to_ptr.vmem [resolvable:$false] %s2739_s24 }
  0x68   : > { %s2741_s13 = scalar_lea.vmem %s2740_s24, 2048  ;;  %p2742_p10 = scmp.lt.s32.totalorder %s3057_s5, %s2740_s24 }
  0x69   : > { %p2737_p5 = pnand %p2735_p3, %p2975_p12  ;;  %p2743_p4 = scmp.lt.s32.totalorder %s2741_s13, %s2734_s15 }
  0x6b   : > { %p2738_p6 = pneg %p2737_p5  ;;  %p2744_p13 = por %p2743_p4, %p2742_p10 }
  0x6d   : > { %p2745_p1 = pnand %p2744_p13, %p2738_p6 }
  0x6f   : > { %2748 = shalt.err (!%p2745_p1)
}
  0x70   : > { %2521 = dma.hbm_to_vmem [thread:$0]  (!%p2951_p8), %s3055_s12, 1024, %s3057_s5, %s2969_s16, %s3536_s19, %s3536_s19, %s3535_s27  }
  0x71   : > { %p3538_p12 = scmp.ne.s32.totalorder %s3531_s14, 0 }
  0x72   : > { %s528_s3 = sand.u32 (!%p3538_p12), 1, %s2809_s26   ;;  %p3539_p11 = scmp.ne.s32.totalorder (!%p3538_p12), %s3525_s17, 0 }
  0x73   : > { %526 = sbr.rel (%p3538_p12) target bundleno = 2597 (0xa25), region = 72  ;;  %s2256_s23 = sshll.u32 (!%p3538_p12), %s528_s3, 4 }
  0x74   : > { %s529_s20 = scalar_lea.sflag (!%p3538_p12), [#allocation4], %s528_s3  ;;  %s3087_s0 = scalar_lea.vmem (!%p3538_p12), [#allocation3], %s2256_s23 }
  0x7a   : > { %2792 = dma.done.wait (%p3539_p11), %s529_s20, 256  }
  0x7b   : > { %2794 = vsyncadd (%p3539_p11), %s529_s20, 4294967040  ;;  %s537_s21 = sand.u32 1, %s2925_s29   ;;  %s3094_s16 = scalar_lea.vmem [#allocation6], %s2256_s23 }
  0x7c   : > { %s538_s28 = scalar_lea.sflag [#allocation7], %s537_s21 }
  0x7d   : > { %2796 = dma.done.wait (%p3539_p11), %s538_s28, 1280  }
  0x7e   : > { %2798 = vsyncadd (%p3539_p11), %s538_s28, 4294966016  ;;  %s2258_s14 = sshll.u32 %s528_s3, 6  ;;  %p627_p8 = scmp.lt.s32.totalorder %s2925_s29, 1 }
  0x7f   : > { %s3540_s3 = sld [smem:[#allocation20_spill]]  ;;  %s3142_s23 = scalar_lea.vmem [#allocation8], %s2258_s14 }
  0x80   : > { %s3102_s27 = scalar_select %p627_p8, %s2925_s29, 1 }
  0x81   : > { %p2261_p2 = scmp.ne.s32.totalorder %s2925_s29, 0 }
  0x82   : > { %s641_s21 = scalar_lea.vmem %s3497_s7, %s3102_s27  ;;  %s644_s5 = scalar_lea.vmem %s3498_s8, %s3102_s27  ;;  %vm663_vm0 = vcmask (!%p2261_p2), 261120  }
  0x83   : > { %s2311_s17 = sshll.u32 %s3102_s27, 4  ;;  %s652_s18 = scalar_lea.vmem %s3500_s10, %s3102_s27 }
  0x84   : > { %s3136_s15 = scalar_lea.vmem %s3499_s9, %s2311_s17  ;;  %660 = sbr.rel (%p2261_p2) target bundleno = 141 (0x8d), region = 88 }
  0x85   : > { %s655_s22 = scalar_lea.vmem %s3540_s3, %s3102_s27  ;;  %s3541_s19 = sld [smem:[#allocation16_spill]] (!%p2261_p2) }
  0x8b   : > { %v661_v0 = vld [vmem:[%s3541_s19] sm:$0xff]  ;;  %v662_v1 = vld [vmem:[%s3541_s19 + $0x8] sm:$0xff] }
  0x8c   : > { %664 = vst.msk [vmem:[#allocation2] sm:$0xff] %vm663_vm0, %v661_v0  ;;  %665 = vst.msk [vmem:[#allocation2 + $0x8] sm:$0xff] %vm663_vm0, %v662_v1 }
  0x8d PF: > { %vm670_vm1 = vcmask 261120   ;;  %v2601_v10 = vld [vmem:[%s3087_s0] sm:$0xff]   ;;  %v2824_v11 = vmov 0.0   ;;  %vm2825_vm2 = vmmov 0   ;;  %v2602_v12 = vld [vmem:[%s3087_s0 + $0x8] sm:$0xff]   ;;  %s3542_s17 = scalar_lea.vmem %s3491_s1, %s3102_s27  ;;  %s3543_s25 = scalar_lea.vmem %s3492_s2, %s3102_s27  ;;  %vm817_vm3 = vcmask 64512  }
  0x8e   : > { %2362 = vmatprep.subr.bf16.mxu0 %v2824_v11  ;;  %2366 = vmatprep.mubr.msk.bf16.mxu0 %vm2825_vm2, %v2824_v11  ;;  %v2262_v30 = vld [vmem:[%s3542_s17] ss:$0 sm:$0xff]  ;;  %s3544_s20 = scalar_lea.vmem %s3494_s4, %s3102_s27  ;;  %s2826_s28 = smov 112   ;;  %vm1316_vm4 = vcmask 1043456   ;;  %vm1722_vm5 = vcmask 130048   ;;  %vm1725_vm6 = vcmask 195584  }
  0x8f   : > { %2363 = vmatpush3.bf16.msra.mxu0 %v2601_v10  ;;  %2382 = vmatprep.subr.bf16.mxu1 %v2824_v11  ;;  %v2263_v35 = vld [vmem:[%s3543_s25] ss:$0 sm:$0xff]  ;;  %s2827_s11 = smov 120   ;;  %s2828_s12 = smov 104  }
  0x90   : > { %2364 = vmatprep.subr.bf16.mxu0 %v2824_v11  ;;  %2384 = vmatprep.mubr.msk.bf16.mxu1 %vm2825_vm2, %v2824_v11  ;;  %v2264_v40 = vld [vmem:[%s3544_s20] ss:$0 sm:$0xff]  ;;  %s2829_s0 = smov 96   ;;  %s2830_s14 = smov 64  }
  0x91   : > { %s2831_s17 = smov 8   ;;  %s2832_s30 = smov 16  }
  0x92   : > { %s2833_s3 = smov 24   ;;  %s3545_s24 = scalar_lea.vmem %s3496_s6, %s3102_s27 }
  0x93   : > { %v3151_v2 = vld [vmem:[#allocation2] sm:$0xff]  ;;  %v3153_v3 = vld [vmem:[#allocation2 + $0x8] sm:$0xff]  ;;  %2365 = vmatpush3.bf16.msra.mxu0 %v2602_v12  ;;  %p2303_p7 = scmp.ne.s32.totalorder %s2925_s29, 1 }
  0x94   : > { %v671_v4 = vsel %vm670_vm1, %v3151_v2, 0.0  ;;  %v680_v5 = vmul.f32 %v3151_v2, %v3151_v2  ;;  %v674_v6 = vsel %vm670_vm1, %v3153_v3, 0.0  ;;  %v681_v7 = vmul.f32 %v3153_v3, %v3153_v3  ;;  %2370 = vmatprep.subr.bf16.mxu0 %v2824_v11 }
  0x95   : > { %672 = vadd.xlane.f32.xlu0 %v671_v4 }
  0x96   : > { %v682_v8 = vsel %vm670_vm1, %v680_v5, 0.0  ;;  %v685_v9 = vsel %vm670_vm1, %v681_v7, 0.0 }
  0x97   : > { %683 = vadd.xlane.f32.xlu1 %v682_v8 }
  0x99   : > { %675 = vadd.xlane.f32.xlu0 %v674_v6 }
  0x9b   : > { %686 = vadd.xlane.f32.xlu1 %v685_v9 }
 0x122   : > { %v673_v13 = vpop.xlane.xlu0 %672 }
 0x123   : > { %v678_v14 = vmul.f32 0.03125, %v673_v13 }
 0x124   : > { %v684_v15 = vpop.xlane.xlu1 %683 }
 0x125   : > { %v690_v16 = vmul.f32 %v678_v14, %v678_v14  ;;  %v688_v17 = vmul.f32 0.03125, %v684_v15  ;;  %v694_v27 = vsub.f32 %v3151_v2, %v678_v14 }
 0x126   : > { %v676_v18 = vpop.xlane.xlu0 %675 }
 0x127   : > { %v692_v19 = vsub.f32 %v688_v17, %v690_v16  ;;  %v679_v20 = vmul.f32 0.03125, %v676_v18 }
 0x128   : > { %v687_v21 = vpop.xlane.xlu1 %686 }
 0x129   : > { %v696_v22 = vadd.f32 1e-05, %v692_v19  ;;  %v691_v23 = vmul.f32 %v679_v20, %v679_v20  ;;  %v689_v24 = vmul.f32 0.03125, %v687_v21  ;;  %v695_v31 = vsub.f32 %v3153_v3, %v679_v20 }
 0x12b   : > { %2615 = vrsqrt.f32 %v696_v22  ;;  %v693_v25 = vsub.f32 %v689_v24, %v691_v23 }
 0x12d   : > { %v697_v26 = vadd.f32 1e-05, %v693_v25 }
 0x12f   : > { %2617 = vrsqrt.f32 %v697_v26 }
 0x135   : > { %v2616_v28 = vpop.eup %2615 }
 0x136   : > { %v700_v29 = vmul.f32 %v2616_v28, %v694_v27 }
 0x138   : > { %v708_v34 = vmul.f32 %v2262_v30, %v700_v29 }
 0x139   : > { %v2618_v32 = vpop.eup %2617 }
 0x13a   : > { %v701_v33 = vmul.f32 %v2618_v32, %v695_v31  ;;  %v716_v37 = vadd.f32 %v2263_v35, %v708_v34 }
 0x13c   : > { %v709_v36 = vmul.f32 %v2262_v30, %v701_v33 }
 0x13e   : > { %v717_v38 = vadd.f32 %v2263_v35, %v709_v36 }
 0x140   : > { %v718_v39 = vpack.c.bf16 %v717_v38, %v716_v37 }
 0x142   : > { %2367 = vmatmul.mubr.msk.bf16.vlgmr.msra.gmra.mrb[0].mxu0 %vm670_vm1, %v718_v39 }
 0x143   : > { %2372 = vmatprep.mubr.msk.bf16.mxu0 %vm2825_vm2, %v2824_v11 }
 0x215   : > { %v779_v41 = vpop.f32.mrb[0].mxu0 }
 0x216   : > { %v2368_v42 = vpop.f32.mrb[1].mxu0  ;;  %v780_v44 = vadd.f32 %v2264_v40, %v779_v41 }
 0x217   : > { %v782_v43 = vpop.f32.mrb[2].mxu0 }
 0x218   : > { %v783_v45 = vadd.f32 %v2264_v40, %v782_v43  ;;  %v2369_v46 = vpop.f32.mrb[3].mxu0  ;;  %v806_v49 = vpack.c.bf16 %v780_v44, %v780_v44 }
 0x21a   : > { %v2576_v47 = vpack.i.bf16 %v783_v45, %v780_v44  ;;  %v3195_v48 = vpack.c.bf16 %v783_v45, %v783_v45 }
 0x21c   : > { %2577 = vrot.lane.b32.xlu1 %v2576_v47, %s2826_s28  ;;  %2572 = vrot.lane.b32.xlu0 %v2576_v47, %s2827_s11 }
 0x220   : > { %2582 = vrot.lane.b32.xlu1 %v2576_v47, %s2828_s12  ;;  %865 = vrot.lane.b32.xlu0 %v3195_v48, %s2829_s0 }
 0x224   : > { %815 = vrot.lane.b32.xlu1 %v806_v49, %s2829_s0 }
 0x28e   : > { %v2578_v50 = vpop.permute.xlu1 %2577  ;;  %v2573_v51 = vpop.permute.xlu0 %2572 }
 0x28f   : > { %v2575_v52 = vunpack.i.h.bf16 %v2573_v51  ;;  %v2574_v53 = vunpack.i.l.bf16 %v2573_v51  ;;  %v2580_v54 = vunpack.i.h.bf16 %v2578_v50  ;;  %v2579_v55 = vunpack.i.l.bf16 %v2578_v50 }
 0x291   : > { %v3198_v56 = vpack.c.bf16 %v2575_v52, %v2575_v52  ;;  %v3200_v57 = vpack.c.bf16 %v2574_v53, %v2574_v53  ;;  %v3204_v59 = vpack.c.bf16 %v2580_v54, %v2580_v54  ;;  %v3206_v60 = vpack.c.bf16 %v2579_v55, %v2579_v55 }
 0x292   : > { %v2583_v58 = vpop.permute.xlu1 %2582  ;;  %v866_v5 = vpop.permute.xlu0 %865 }
 0x293   : > { %914 = vrot.lane.b32.xlu1 %v3200_v57, %s2829_s0  ;;  %963 = vrot.lane.b32.xlu0 %v3198_v56, %s2829_s0  ;;  %v2585_v61 = vunpack.i.h.bf16 %v2583_v58  ;;  %v2584_v62 = vunpack.i.l.bf16 %v2583_v58  ;;  %v871_v6 = vsel %vm817_vm3, %v866_v5, 0 }
 0x295   : > { %v3211_v1 = vpack.c.bf16 %v2585_v61, %v2585_v61  ;;  %v3213_v4 = vpack.c.bf16 %v2584_v62, %v2584_v62 }
 0x296   : > { %v816_v63 = vpop.permute.xlu1 %815 }
 0x297   : > { %v822_v0 = vsel %vm817_vm3, %v816_v63, 0  ;;  %1012 = vrot.lane.b32.xlu1 %v3206_v60, %s2829_s0  ;;  %1061 = vrot.lane.b32.xlu0 %v3204_v59, %s2829_s0 }
 0x298   : > { %2371 = vmatpush3.bf16.xpose.msra.mxu0 %v822_v0 }
 0x299   : > { %2376 = vmatprep.subr.bf16.mxu0 %v2824_v11 }
 0x29b   : > { %1110 = vrot.lane.b32.xlu1 %v3213_v4, %s2829_s0  ;;  %1159 = vrot.lane.b32.xlu0 %v3211_v1, %s2829_s0 }
 0x29f   : > { %2373 = vmatmul.mubr.msk.bf16.vlgmr.msra.gmra.mrb[4].mxu0 %vm817_vm3, %v806_v49  ;;  %1311 = vrot.lane.b32.xlu1 %v806_v49, %s2830_s14 }
 0x2a0   : > { %2377 = vmatpush3.bf16.xpose.msra.mxu0 %v871_v6  ;;  %2378 = vmatprep.mubr.msk.bf16.mxu0 %vm2825_vm2, %v2824_v11 }
 0x2a1   : > { %2388 = vmatprep.subr.bf16.mxu0 %v2824_v11 }
 0x2a7   : > { %2379 = vmatmul.mubr.msk.bf16.vlgmr.msra.gmra.mrb[8].mxu0 %vm817_vm3, %v3195_v48 }
 0x2a8   : > { %2390 = vmatprep.mubr.msk.bf16.mxu0 %vm2825_vm2, %v2824_v11 }
 0x305   : > { %v915_v7 = vpop.permute.xlu1 %914  ;;  %v964_v8 = vpop.permute.xlu0 %963 }
 0x306   : > { %v969_v9 = vsel %vm817_vm3, %v964_v8, 0  ;;  %v920_v10 = vsel %vm817_vm3, %v915_v7, 0 }
 0x307   : > { %2383 = vmatpush3.bf16.xpose.msra.mxu1 %v920_v10  ;;  %2389 = vmatpush3.bf16.xpose.msra.mxu0 %v969_v9 }
 0x308   : > { %2394 = vmatprep.subr.bf16.mxu1 %v2824_v11  ;;  %2400 = vmatprep.subr.bf16.mxu0 %v2824_v11 }
 0x309   : > { %v1013_v12 = vpop.permute.xlu1 %1012  ;;  %v1062_v13 = vpop.permute.xlu0 %1061 }
 0x30a   : > { %v1018_v14 = vsel %vm817_vm3, %v1013_v12, 0  ;;  %v1067_v15 = vsel %vm817_vm3, %v1062_v13, 0 }
 0x30d   : > { %v1111_v16 = vpop.permute.xlu1 %1110  ;;  %v1160_v17 = vpop.permute.xlu0 %1159 }
 0x30e   : > { %2385 = vmatmul.mubr.msk.bf16.vlgmr.msra.gmra.mrb[0].mxu1 %vm817_vm3, %v3200_v57  ;;  %2391 = vmatmul.mubr.msk.bf16.vlgmr.msra.gmra.mrb[12].mxu0 %vm817_vm3, %v3198_v56  ;;  %v1116_v18 = vsel %vm817_vm3, %v1111_v16, 0  ;;  %v1165_v19 = vsel %vm817_vm3, %v1160_v17, 0 }
 0x30f   : > { %2395 = vmatpush3.bf16.xpose.msra.mxu1 %v1018_v14  ;;  %2401 = vmatpush3.bf16.xpose.msra.mxu0 %v1067_v15 }
 0x310   : > { %2396 = vmatprep.mubr.msk.bf16.mxu1 %vm2825_vm2, %v2824_v11  ;;  %2402 = vmatprep.mubr.msk.bf16.mxu0 %vm2825_vm2, %v2824_v11 }
 0x311   : > { %2406 = vmatprep.subr.bf16.mxu1 %v2824_v11  ;;  %2412 = vmatprep.subr.bf16.mxu0 %v2824_v11  ;;  %v1312_v20 = vpop.permute.xlu1 %1311 }
 0x312   : > { %v1318_v21 = vsel %vm1316_vm4, %v1312_v20, 0 }
 0x316   : > { %2397 = vmatmul.mubr.msk.bf16.vlgmr.msra.gmra.mrb[4].mxu1 %vm817_vm3, %v3206_v60  ;;  %2403 = vmatmul.mubr.msk.bf16.vlgmr.msra.gmra.mrb[16].mxu0 %vm817_vm3, %v3204_v59 }
 0x317   : > { %2407 = vmatpush3.bf16.xpose.msra.mxu1 %v1116_v18  ;;  %2413 = vmatpush3.bf16.xpose.msra.mxu0 %v1165_v19 }
 0x318   : > { %2408 = vmatprep.mubr.msk.bf16.mxu1 %vm2825_vm2, %v2824_v11  ;;  %2414 = vmatprep.mubr.msk.bf16.mxu0 %vm2825_vm2, %v2824_v11 }
 0x319   : > { %2418 = vmatprep.subr.bf16.mxu1 %v2824_v11  ;;  %2424 = vmatprep.subr.bf16.mxu0 %v2824_v11 }
 0x31e   : > { %2409 = vmatmul.mubr.msk.bf16.vlgmr.msra.gmra.mrb[8].mxu1 %vm817_vm3, %v3213_v4  ;;  %2415 = vmatmul.mubr.msk.bf16.vlgmr.msra.gmra.mrb[20].mxu0 %vm817_vm3, %v3211_v1 }
 0x31f   : > { %2419 = vmatpush3.bf16.msra.mxu1 %v1318_v21  ;;  %2426 = vmatprep.mubr.msk.bf16.mxu0 %vm2825_vm2, %v2824_v11 }
 0x320   : > { %2420 = vmatprep.mubr.msk.bf16.mxu1 %vm2825_vm2, %v2824_v11  ;;  %2430 = vmatprep.subr.bf16.mxu1 %v2824_v11 }
 0x372   : > { %v858_v22 = vpop.f32.mrb[4].mxu0 }
 0x373   : > { %v3266_v23 = vmul.f32 0.35355338, %v858_v22  ;;  %v2374_v24 = vpop.f32.mrb[5].mxu0 }
 0x374   : > { %v861_v25 = vpop.f32.mrb[6].mxu0 }
 0x375   : > { %v2375_v26 = vpop.f32.mrb[7].mxu0  ;;  %v1215_v27 = vsel %vm817_vm3, %v3266_v23, -inf }
 0x376   : > { %1216 = vmax.xlane.f32.xlu1 %v1215_v27 }
 0x37a   : > { %v907_v28 = vpop.f32.mrb[8].mxu0 }
 0x37b   : > { %v1208_v29 = vmul.f32 0.35355338, %v907_v28  ;;  %v2380_v30 = vpop.f32.mrb[9].mxu0 }
 0x37c   : > { %v910_v31 = vpop.f32.mrb[10].mxu0 }
 0x37d   : > { %v2381_v32 = vpop.f32.mrb[11].mxu0  ;;  %v1218_v33 = vsel %vm817_vm3, %v1208_v29, -inf }
 0x37e   : > { %1219 = vmax.xlane.f32.xlu0 %v1218_v33 }
 0x3e1   : > { %v956_v34 = vpop.f32.mrb[0].mxu1  ;;  %v1005_v35 = vpop.f32.mrb[12].mxu0 }
 0x3e2   : > { %v1209_v36 = vmul.f32 0.35355338, %v956_v34  ;;  %v2386_v37 = vpop.f32.mrb[1].mxu1  ;;  %v2392_v38 = vpop.f32.mrb[13].mxu0  ;;  %v1210_v41 = vmul.f32 0.35355338, %v1005_v35 }
 0x3e3   : > { %v959_v39 = vpop.f32.mrb[2].mxu1  ;;  %v1008_v40 = vpop.f32.mrb[14].mxu0 }
 0x3e4   : > { %v2387_v42 = vpop.f32.mrb[3].mxu1  ;;  %v2393_v43 = vpop.f32.mrb[15].mxu0  ;;  %v1221_v44 = vsel %vm817_vm3, %v1209_v36, -inf  ;;  %v1224_v45 = vsel %vm817_vm3, %v1210_v41, -inf }
 0x3e5   : > { %1222 = vmax.xlane.f32.xlu0 %v1221_v44 }
 0x3e9   : > { %v1054_v46 = vpop.f32.mrb[4].mxu1  ;;  %1225 = vmax.xlane.f32.xlu0 %v1224_v45  ;;  %v1103_v47 = vpop.f32.mrb[16].mxu0 }
 0x3ea   : > { %v1211_v49 = vmul.f32 0.35355338, %v1054_v46  ;;  %v3273_v50 = vmul.f32 0.35355338, %v1103_v47  ;;  %v2398_v51 = vpop.f32.mrb[5].mxu1  ;;  %v2404_v52 = vpop.f32.mrb[17].mxu0 }
 0x3eb   : > { %v1057_v53 = vpop.f32.mrb[6].mxu1  ;;  %v1106_v54 = vpop.f32.mrb[18].mxu0 }
 0x3ec   : > { %v2399_v55 = vpop.f32.mrb[7].mxu1  ;;  %v2405_v58 = vpop.f32.mrb[19].mxu0  ;;  %v1227_v61 = vsel %vm817_vm3, %v1211_v49, -inf  ;;  %v1230_v62 = vsel %vm817_vm3, %v3273_v50, -inf }
 0x3ed   : > { %1228 = vmax.xlane.f32.xlu1 %v1227_v61  ;;  %1231 = vmax.xlane.f32.xlu0 %v1230_v62 }
 0x3f1   : > { %v1152_v63 = vpop.f32.mrb[8].mxu1  ;;  %v1201_v0 = vpop.f32.mrb[20].mxu0 }
 0x3f2   : > { %v1213_v5 = vmul.f32 0.35355338, %v1152_v63  ;;  %v3278_v6 = vmul.f32 0.35355338, %v1201_v0  ;;  %v2410_v7 = vpop.f32.mrb[9].mxu1  ;;  %v2416_v8 = vpop.f32.mrb[21].mxu0 }
 0x3f3   : > { %v1155_v9 = vpop.f32.mrb[10].mxu1  ;;  %v1204_v10 = vpop.f32.mrb[22].mxu0 }
 0x3f4   : > { %v2411_v12 = vpop.f32.mrb[11].mxu1  ;;  %v2417_v13 = vpop.f32.mrb[23].mxu0  ;;  %v1233_v14 = vsel %vm817_vm3, %v1213_v5, -inf  ;;  %v1236_v15 = vsel %vm817_vm3, %v3278_v6, -inf }
 0x3f5   : > { %1234 = vmax.xlane.f32.xlu1 %v1233_v14  ;;  %1237 = vmax.xlane.f32.xlu0 %v1236_v15 }
 0x403   : > { %v1217_v18 = vpop.xlane.xlu1 %1216 }
 0x404   : > { %v1239_v19 = vsub.f32 %v3266_v23, %v1217_v18 }
 0x406   : > { %1408 = vrot.lane.b32.xlu1 %v3200_v57, %s2830_s14  ;;  %v1247_v21 = vmul.f32 1.442695, %v1239_v19 }
 0x40a   : > { %1456 = vrot.lane.b32.xlu1 %v3198_v56, %s2830_s14 }
 0x40b   : > { %1360 = vrot.lane.b32.xlu0 %v3195_v48, %s2830_s14  ;;  %v1220_v16 = vpop.xlane.xlu0 %1219 }
 0x40c   : > { %v1240_v17 = vsub.f32 %v1208_v29, %v1220_v16 }
 0x40e   : > { %v1249_v20 = vmul.f32 1.442695, %v1240_v17 }
 0x410   : > { %2619 = vpow2.f32 %v1249_v20 }
 0x411   : > { %2621 = vpow2.f32 %v1247_v21 }
 0x41a   : > { %v2620_v22 = vpop.eup %2619 }
 0x41b   : > { %v1266_v24 = vsel %vm817_vm3, %v2620_v22, 0.0  ;;  %v3291_v25 = vpop.eup %2621 }
 0x41c   : > { %v1263_v56 = vsel %vm817_vm3, %v3291_v25, 0.0 }
 0x42a   : > { %1267 = vadd.xlane.f32.xlu0 %v1266_v24 }
 0x42e   : > { %1264 = vadd.xlane.f32.xlu1 %v1263_v56 }
 0x43f   : > { %1504 = vrot.lane.b32.xlu1 %v3206_v60, %s2830_s14 }
 0x472   : > { %v1223_v48 = vpop.xlane.xlu0 %1222 }
 0x473   : > { %v1241_v57 = vsub.f32 %v1209_v36, %v1223_v48 }
 0x475   : > { %v1251_v23 = vmul.f32 1.442695, %v1241_v57 }
 0x476   : > { %v1226_v26 = vpop.xlane.xlu0 %1225 }
 0x477   : > { %2623 = vpow2.f32 %v1251_v23  ;;  %v1242_v27 = vsub.f32 %v1210_v41, %v1226_v26 }
 0x479   : > { %v1253_v28 = vmul.f32 1.442695, %v1242_v27 }
 0x47a   : > { %v1229_v29 = vpop.xlane.xlu1 %1228  ;;  %v1232_v32 = vpop.xlane.xlu0 %1231 }
 0x47b   : > { %2625 = vpow2.f32 %v1253_v28  ;;  %v1243_v30 = vsub.f32 %v1211_v49, %v1229_v29  ;;  %v1244_v46 = vsub.f32 %v3273_v50, %v1232_v32 }
 0x47d   : > { %v1255_v31 = vmul.f32 1.442695, %v1243_v30  ;;  %v1257_v47 = vmul.f32 1.442695, %v1244_v46 }
 0x47f   : > { %2627 = vpow2.f32 %v1255_v31 }
 0x481   : > { %v3297_v33 = vpop.eup %2623 }
 0x482   : > { %v1235_v34 = vpop.xlane.xlu1 %1234  ;;  %v1238_v35 = vpop.xlane.xlu0 %1237  ;;  %v1269_v60 = vsel %vm817_vm3, %v3297_v33, 0.0 }
 0x483   : > { %v1245_v37 = vsub.f32 %v1213_v5, %v1235_v34  ;;  %1270 = vadd.xlane.f32.xlu1 %v1269_v60  ;;  %v1246_v49 = vsub.f32 %v3278_v6, %v1238_v35 }
 0x485   : > { %v3301_v36 = vpop.eup %2625  ;;  %v1259_v38 = vmul.f32 1.442695, %v1245_v37  ;;  %v1261_v51 = vmul.f32 1.442695, %v1246_v49 }
 0x486   : > { %v1361_v39 = vpop.permute.xlu0 %1360  ;;  %v1272_v40 = vsel %vm817_vm3, %v3301_v36, 0.0  ;;  %v1409_v52 = vpop.permute.xlu1 %1408 }
 0x487   : > { %2629 = vpow2.f32 %v1259_v38  ;;  %v1366_v41 = vsel %vm1316_vm4, %v1361_v39, 0  ;;  %1273 = vadd.xlane.f32.xlu0 %v1272_v40  ;;  %v1414_v8 = vsel %vm1316_vm4, %v1409_v52, 0 }
 0x488   : > { %2425 = vmatpush3.bf16.msra.mxu0 %v1366_v41  ;;  %2631 = vpow2.f32 %v1257_v47 }
 0x489   : > { %v3306_v42 = vpop.eup %2627  ;;  %2436 = vmatprep.subr.bf16.mxu0 %v2824_v11  ;;  %2633 = vpow2.f32 %v1261_v51 }
 0x48a   : > { %v1275_v43 = vsel %vm817_vm3, %v3306_v42, 0.0  ;;  %v1457_v53 = vpop.permute.xlu1 %1456 }
 0x48b   : > { %1276 = vadd.xlane.f32.xlu1 %v1275_v43  ;;  %v1462_v5 = vsel %vm1316_vm4, %v1457_v53, 0 }
 0x491   : > { %v3311_v44 = vpop.eup %2629 }
 0x492   : > { %v1281_v45 = vsel %vm817_vm3, %v3311_v44, 0.0  ;;  %v3321_v55 = vpop.eup %2631 }
 0x493   : > { %1282 = vadd.xlane.f32.xlu1 %v1281_v45  ;;  %v3325_v61 = vpop.eup %2633 }
 0x49d   : > { %1552 = vrot.lane.b32.xlu0 %v3204_v59, %s2830_s14  ;;  %v1278_v59 = vsel %vm817_vm3, %v3321_v55, 0.0 }
 0x4a4   : > { %1600 = vrot.lane.b32.xlu1 %v3213_v4, %s2830_s14  ;;  %v1284_v4 = vsel %vm817_vm3, %v3325_v61, 0.0 }
 0x4b7   : > { %v1268_v54 = vpop.xlane.xlu0 %1267 }
 0x4b8   : > { %2635 = vrcp.f32 %v1268_v54 }
 0x4bb   : > { %v1265_v58 = vpop.xlane.xlu1 %1264 }
 0x4bc   : > { %2637 = vrcp.f32 %v1265_v58  ;;  %1279 = vadd.xlane.f32.xlu0 %v1278_v59 }
 0x4bf   : > { %v1505_v9 = vpop.permute.xlu1 %1504 }
 0x4c0   : > { %1285 = vadd.xlane.f32.xlu0 %v1284_v4  ;;  %v1510_v18 = vsel %vm1316_vm4, %v1505_v9, 0 }
 0x4c2   : > { %v2636_v50 = vpop.eup %2635 }
 0x4c3   : > { %v1296_v62 = vmul.f32 %v2636_v50, %v2620_v22 }
 0x4c5   : > { %v1304_v63 = vpack.c.bf16 %v1296_v62, %v1296_v62 }
 0x4c6   : > { %v2638_v0 = vpop.eup %2637 }
 0x4c7   : > { %v1295_v6 = vmul.f32 %v2638_v0, %v3291_v25  ;;  %2427 = vmatmul.mubr.msk.bf16.vlgmr.msra.gmra.mrb[24].mxu0 %vm817_vm3, %v1304_v63 }
 0x4c8   : > { %2437 = vmatpush3.bf16.msra.mxu0 %v1462_v5  ;;  %2438 = vmatprep.mubr.msk.bf16.mxu0 %vm2825_vm2, %v2824_v11  ;;  %v2603_v5 = vld [vmem:[%s3094_s16] sm:$0xff]  }
 0x4c9   : > { %v1303_v7 = vpack.c.bf16 %v1295_v6, %v1295_v6  ;;  %2448 = vmatprep.subr.bf16.mxu0 %v2824_v11  ;;  %v2604_v6 = vld [vmem:[%s3094_s16 + $0x8] sm:$0xff]  }
 0x4cb   : > { %2421 = vmatmul.mubr.msk.bf16.vlgmr.msra.gmra.mrb[12].mxu1 %vm817_vm3, %v1303_v7 }
 0x4cc   : > { %2431 = vmatpush3.bf16.msra.mxu1 %v1414_v8  ;;  %2432 = vmatprep.mubr.msk.bf16.mxu1 %vm2825_vm2, %v2824_v11 }
 0x4cd   : > { %2442 = vmatprep.subr.bf16.mxu1 %v2824_v11 }
 0x4d6   : > { %1648 = vrot.lane.b32.xlu0 %v3211_v1, %s2830_s14 }
 0x510   : > { %v1271_v10 = vpop.xlane.xlu1 %1270 }
 0x511   : > { %2639 = vrcp.f32 %v1271_v10 }
 0x514   : > { %v1274_v12 = vpop.xlane.xlu0 %1273 }
 0x515   : > { %2641 = vrcp.f32 %v1274_v12 }
 0x518   : > { %v1277_v13 = vpop.xlane.xlu1 %1276  ;;  %v1553_v1 = vpop.permute.xlu0 %1552 }
 0x519   : > { %2643 = vrcp.f32 %v1277_v13  ;;  %v1558_v25 = vsel %vm1316_vm4, %v1553_v1, 0 }
 0x51b   : > { %v2640_v14 = vpop.eup %2639 }
 0x51c   : > { %v1297_v15 = vmul.f32 %v2640_v14, %v3297_v33 }
 0x51e   : > { %v1305_v16 = vpack.c.bf16 %v1297_v15, %v1297_v15 }
 0x51f   : > { %v2642_v17 = vpop.eup %2641 }
 0x520   : > { %v1298_v19 = vmul.f32 %v2642_v17, %v3301_v36  ;;  %2433 = vmatmul.mubr.msk.bf16.vlgmr.msra.gmra.mrb[16].mxu1 %vm817_vm3, %v1305_v16  ;;  %v1283_v20 = vpop.xlane.xlu1 %1282 }
 0x521   : > { %2443 = vmatpush3.bf16.msra.mxu1 %v1510_v18  ;;  %2645 = vrcp.f32 %v1283_v20  ;;  %2444 = vmatprep.mubr.msk.bf16.mxu1 %vm2825_vm2, %v2824_v11 }
 0x522   : > { %v1306_v21 = vpack.c.bf16 %v1298_v19, %v1298_v19  ;;  %2454 = vmatprep.subr.bf16.mxu1 %v2824_v11 }
 0x523   : > { %v2644_v22 = vpop.eup %2643 }
 0x524   : > { %v1299_v24 = vmul.f32 %v2644_v22, %v3306_v42  ;;  %2439 = vmatmul.mubr.msk.bf16.vlgmr.msra.gmra.mrb[28].mxu0 %vm817_vm3, %v1306_v21  ;;  %v1601_v56 = vpop.permute.xlu1 %1600 }
 0x525   : > { %2449 = vmatpush3.bf16.msra.mxu0 %v1558_v25  ;;  %2450 = vmatprep.mubr.msk.bf16.mxu0 %vm2825_vm2, %v2824_v11  ;;  %v1606_v57 = vsel %vm1316_vm4, %v1601_v56, 0 }
 0x526   : > { %v1307_v48 = vpack.c.bf16 %v1299_v24, %v1299_v24  ;;  %2460 = vmatprep.subr.bf16.mxu0 %v2824_v11 }
 0x528   : > { %2445 = vmatmul.mubr.msk.bf16.vlgmr.msra.gmra.mrb[20].mxu1 %vm817_vm3, %v1307_v48 }
 0x529   : > { %2455 = vmatpush3.bf16.msra.mxu1 %v1606_v57  ;;  %2456 = vmatprep.mubr.msk.bf16.mxu1 %vm2825_vm2, %v2824_v11 }
 0x52a   : > { %2466 = vmatprep.subr.bf16.mxu1 %v2824_v11 }
 0x52b   : > { %v2646_v23 = vpop.eup %2645 }
 0x52c   : > { %v1301_v26 = vmul.f32 %v2646_v23, %v3311_v44 }
 0x52e   : > { %v1309_v27 = vpack.c.bf16 %v1301_v26, %v1301_v26 }
 0x530   : > { %2457 = vmatmul.mubr.msk.bf16.vlgmr.msra.gmra.mrb[24].mxu1 %vm817_vm3, %v1309_v27 }
 0x531   : > { %2470 = vmatprep.mubr.msk.bf16.mxu1 %vm2825_vm2, %v2824_v11  ;;  %2467 = vmatpush3.bf16.msra.mxu1 %v2603_v5 }
 0x532   : > { %2468 = vmatprep.subr.bf16.mxu1 %v2824_v11 }
 0x535   : > { %2469 = vmatpush3.bf16.msra.mxu1 %v2604_v6 }
 0x536   : > { %2482 = vmatprep.subr.bf16.mxu1 %v2824_v11 }
 0x549   : > { %v1280_v28 = vpop.xlane.xlu0 %1279 }
 0x54a   : > { %2647 = vrcp.f32 %v1280_v28 }
 0x54d   : > { %v1286_v29 = vpop.xlane.xlu0 %1285 }
 0x54e   : > { %2649 = vrcp.f32 %v1286_v29 }
 0x551   : > { %v1649_v32 = vpop.permute.xlu0 %1648 }
 0x552   : > { %v1654_v35 = vsel %vm1316_vm4, %v1649_v32, 0 }
 0x554   : > { %v2648_v30 = vpop.eup %2647 }
 0x555   : > { %v1300_v31 = vmul.f32 %v2648_v30, %v3321_v55 }
 0x557   : > { %v1308_v33 = vpack.c.bf16 %v1300_v31, %v1300_v31  ;;  %v2287_v31 = vld [vmem:[%s3545_s24] ss:$0 sm:$0xff] }
 0x558   : > { %v2650_v34 = vpop.eup %2649 }
 0x559   : > { %2451 = vmatmul.mubr.msk.bf16.vlgmr.msra.gmra.mrb[32].mxu0 %vm817_vm3, %v1308_v33  ;;  %v1302_v60 = vmul.f32 %v2650_v34, %v3325_v61 }
 0x55a   : > { %2461 = vmatpush3.bf16.msra.mxu0 %v1654_v35  ;;  %2462 = vmatprep.mubr.msk.bf16.mxu0 %vm2825_vm2, %v2824_v11 }
 0x55b   : > { %2474 = vmatprep.subr.bf16.mxu0 %v2824_v11  ;;  %v1310_v37 = vpack.c.bf16 %v1302_v60, %v1302_v60 }
 0x561   : > { %2463 = vmatmul.mubr.msk.bf16.vlgmr.msra.gmra.mrb[36].mxu0 %vm817_vm3, %v1310_v37 }
 0x562   : > { %2478 = vmatprep.mubr.msk.bf16.mxu0 %vm2825_vm2, %v2824_v11 }
 0x59a   : > { %v1402_v36 = vpop.f32.mrb[24].mxu0 }
 0x59b   : > { %v2428_v38 = vpop.f32.mrb[25].mxu0 }
 0x59c   : > { %v1405_v39 = vpop.f32.mrb[26].mxu0 }
 0x59d   : > { %v2429_v40 = vpop.f32.mrb[27].mxu0 }
 0x59e   : > { %v1354_v41 = vpop.f32.mrb[12].mxu1 }
 0x59f   : > { %v2422_v42 = vpop.f32.mrb[13].mxu1 }
 0x5a0   : > { %v1357_v43 = vpop.f32.mrb[14].mxu1  ;;  %v2605_v42 = vld [vmem:[%s3136_s15] sm:$0xff]  }
 0x5a1   : > { %v2423_v44 = vpop.f32.mrb[15].mxu1  ;;  %2475 = vmatpush3.bf16.msra.mxu0 %v2605_v42  ;;  %v2606_v43 = vld [vmem:[%s3136_s15 + $0x8] sm:$0xff]  }
 0x5a2   : > { %2476 = vmatprep.subr.bf16.mxu0 %v2824_v11 }
 0x5a5   : > { %2477 = vmatpush3.bf16.msra.mxu0 %v2606_v43  ;;  %v2294_v43 = vld [vmem:[%s655_s22] ss:$0 sm:$0xff] }
 0x5f3   : > { %v1450_v45 = vpop.f32.mrb[16].mxu1 }
 0x5f4   : > { %v2434_v46 = vpop.f32.mrb[17].mxu1 }
 0x5f5   : > { %v1453_v47 = vpop.f32.mrb[18].mxu1 }
 0x5f6   : > { %v2435_v49 = vpop.f32.mrb[19].mxu1 }
 0x5f7   : > { %v1498_v51 = vpop.f32.mrb[28].mxu0 }
 0x5f8   : > { %v2586_v52 = vpack.i.bf16 %v1498_v51, %v1450_v45  ;;  %v2440_v53 = vpop.f32.mrb[29].mxu0 }
 0x5f9   : > { %v1501_v54 = vpop.f32.mrb[30].mxu0 }
 0x5fa   : > { %2587 = vrot.lane.b32.xlu1 %v2586_v52, %s2831_s17  ;;  %v2441_v55 = vpop.f32.mrb[31].mxu0 }
 0x5fb   : > { %v1546_v58 = vpop.f32.mrb[20].mxu1 }
 0x5fc   : > { %v2446_v59 = vpop.f32.mrb[21].mxu1 }
 0x5fd   : > { %v1549_v61 = vpop.f32.mrb[22].mxu1 }
 0x5fe   : > { %v2447_v4 = vpop.f32.mrb[23].mxu1 }
 0x603   : > { %v1642_v50 = vpop.f32.mrb[24].mxu1 }
 0x604   : > { %v2458_v62 = vpop.f32.mrb[25].mxu1 }
 0x605   : > { %v1645_v63 = vpop.f32.mrb[26].mxu1 }
 0x606   : > { %v2459_v0 = vpop.f32.mrb[27].mxu1 }
 0x607   : > { %v2288_v0 = vld [vmem:[%s641_s21] ss:$0 sm:$0xff] }
 0x62c   : > { %v1594_v7 = vpop.f32.mrb[32].mxu0 }
 0x62d   : > { %v2591_v8 = vpack.i.bf16 %v1594_v7, %v1546_v58  ;;  %v2452_v9 = vpop.f32.mrb[33].mxu0 }
 0x62e   : > { %v1597_v10 = vpop.f32.mrb[34].mxu0  ;;  %v2289_v9 = vld [vmem:[%s644_s5] ss:$0 sm:$0xff] }
 0x62f   : > { %2592 = vrot.lane.b32.xlu0 %v2591_v8, %s2832_s30  ;;  %v2453_v12 = vpop.f32.mrb[35].mxu0 }
 0x634   : > { %v1690_v13 = vpop.f32.mrb[36].mxu0 }
 0x635   : > { %v2596_v14 = vpack.i.bf16 %v1690_v13, %v1642_v50  ;;  %v2464_v15 = vpop.f32.mrb[37].mxu0 }
 0x636   : > { %v1693_v16 = vpop.f32.mrb[38].mxu0  ;;  %v2607_v15 = vld [vmem:[%s3142_s23] sm:$0xff]  }
 0x637   : > { %2597 = vrot.lane.b32.xlu1 %v2596_v14, %s2833_s3  ;;  %v2465_v17 = vpop.f32.mrb[39].mxu0  ;;  %v2608_v16 = vld [vmem:[%s3142_s23 + $0x8] sm:$0xff]  }
 0x638   : > { %v2609_v17 = vld [vmem:[%s3142_s23 + $0x10] sm:$0xff]  }
 0x66c   : > { %v2588_v18 = vpop.permute.xlu1 %2587 }
 0x66d   : > { %v2590_v20 = vunpack.i.h.bf16 %v2588_v18  ;;  %v2589_v1 = vunpack.i.l.bf16 %v2588_v18  ;;  %v2610_v18 = vld [vmem:[%s3142_s23 + $0x18] sm:$0xff]  }
 0x66f   : > { %v1721_v25 = vsel %vm817_vm3, %v1402_v36, %v2590_v20  ;;  %v1720_v56 = vsel %vm817_vm3, %v1354_v41, %v2589_v1  ;;  %v2612_v20 = vld [vmem:[%s3142_s23 + $0x28] sm:$0xff]   ;;  %v2613_v1 = vld [vmem:[%s3142_s23 + $0x30] sm:$0xff]  }
 0x6a1   : > { %v2593_v19 = vpop.permute.xlu0 %2592 }
 0x6a2   : > { %v2595_v21 = vunpack.i.h.bf16 %v2593_v19  ;;  %v2594_v22 = vunpack.i.l.bf16 %v2593_v19  ;;  %v2611_v19 = vld [vmem:[%s3142_s23 + $0x20] sm:$0xff]  }
 0x6a4   : > { %v1724_v23 = vsel %vm1722_vm5, %v1721_v25, %v2595_v21  ;;  %v1723_v26 = vsel %vm1722_vm5, %v1720_v56, %v2594_v22  ;;  %v2614_v21 = vld [vmem:[%s3142_s23 + $0x38] sm:$0xff]   ;;  %v2290_v22 = vld [vmem:[%s652_s18] ss:$0 sm:$0xff] }
 0x6a9   : > { %v2598_v24 = vpop.permute.xlu1 %2597 }
 0x6aa   : > { %v2600_v48 = vunpack.i.h.bf16 %v2598_v24  ;;  %v2599_v57 = vunpack.i.l.bf16 %v2598_v24 }
 0x6ac   : > { %v1727_v27 = vsel %vm1725_vm6, %v1724_v23, %v2600_v48  ;;  %v1726_v28 = vsel %vm1725_vm6, %v1723_v26, %v2599_v57 }
 0x6ad   : > { %v1728_v29 = vpack.c.bf16 %v1727_v27, %v1726_v28 }
 0x6af   : > { %2471 = vmatmul.mubr.msk.bf16.vlgmr.msra.gmra.mrb[28].mxu1 %vm670_vm1, %v1728_v29 }
 0x6b0   : > { %2498 = vmatprep.mubr.msk.bf16.mxu1 %vm2825_vm2, %v2824_v11  ;;  %2483 = vmatpush3.bf16.msra.mxu1 %v2607_v15 }
 0x6b1   : > { %2484 = vmatprep.subr.bf16.mxu1 %v2824_v11 }
 0x6b4   : > { %2485 = vmatpush3.bf16.msra.mxu1 %v2608_v16 }
 0x6b5   : > { %2486 = vmatprep.subr.bf16.mxu1 %v2824_v11 }
 0x6b8   : > { %2487 = vmatpush3.bf16.msra.mxu1 %v2609_v17 }
 0x6b9   : > { %2488 = vmatprep.subr.bf16.mxu1 %v2824_v11 }
 0x6bc   : > { %2489 = vmatpush3.bf16.msra.mxu1 %v2610_v18 }
 0x6bd   : > { %2490 = vmatprep.subr.bf16.mxu1 %v2824_v11 }
 0x6c0   : > { %2491 = vmatpush3.bf16.msra.mxu1 %v2611_v19 }
 0x6c1   : > { %2492 = vmatprep.subr.bf16.mxu1 %v2824_v11 }
 0x6c4   : > { %2493 = vmatpush3.bf16.msra.mxu1 %v2612_v20 }
 0x6c5   : > { %2494 = vmatprep.subr.bf16.mxu1 %v2824_v11 }
 0x6c8   : > { %2495 = vmatpush3.bf16.msra.mxu1 %v2613_v1 }
 0x6c9   : > { %2496 = vmatprep.subr.bf16.mxu1 %v2824_v11 }
 0x6cc   : > { %2497 = vmatpush3.bf16.msra.mxu1 %v2614_v21 }
 0x782   : > { %v1782_v30 = vpop.f32.mrb[28].mxu1 }
 0x783   : > { %v1789_v32 = vadd.f32 %v1782_v30, %v3151_v2  ;;  %v2472_v33 = vpop.f32.mrb[29].mxu1 }
 0x784   : > { %v1785_v34 = vpop.f32.mrb[30].mxu1 }
 0x785   : > { %v3390_v35 = vadd.f32 %v2287_v31, %v1789_v32  ;;  %v1790_v60 = vadd.f32 %v1785_v34, %v3153_v3  ;;  %v2473_v37 = vpop.f32.mrb[31].mxu1 }
 0x787   : > { %v3393_v36 = vadd.f32 %v2287_v31, %v1790_v60  ;;  %v1802_v38 = vsel %vm670_vm1, %v3390_v35, 0.0  ;;  %v1810_v39 = vmul.f32 %v3390_v35, %v3390_v35 }
 0x788   : > { %1803 = vadd.xlane.f32.xlu0 %v1802_v38 }
 0x789   : > { %v1805_v2 = vsel %vm670_vm1, %v3393_v36, 0.0  ;;  %v1812_v40 = vsel %vm670_vm1, %v1810_v39, 0.0  ;;  %v1811_v41 = vmul.f32 %v3393_v36, %v3393_v36 }
 0x78a   : > { %1806 = vadd.xlane.f32.xlu1 %v1805_v2 }
 0x78b   : > { %v1815_v3 = vsel %vm670_vm1, %v1811_v41, 0.0 }
 0x78c   : > { %1813 = vadd.xlane.f32.xlu0 %v1812_v40 }
 0x790   : > { %1816 = vadd.xlane.f32.xlu0 %v1815_v3 }
 0x815   : > { %v1804_v44 = vpop.xlane.xlu0 %1803 }
 0x816   : > { %v1808_v45 = vmul.f32 0.03125, %v1804_v44 }
 0x817   : > { %v1807_v46 = vpop.xlane.xlu1 %1806 }
 0x818   : > { %v1820_v49 = vmul.f32 %v1808_v45, %v1808_v45  ;;  %v1809_v51 = vmul.f32 0.03125, %v1807_v46  ;;  %v1824_v50 = vsub.f32 %v3390_v35, %v1808_v45 }
 0x819   : > { %v1814_v47 = vpop.xlane.xlu0 %1813 }
 0x81a   : > { %v1818_v52 = vmul.f32 0.03125, %v1814_v47  ;;  %v1821_v55 = vmul.f32 %v1809_v51, %v1809_v51  ;;  %v1825_v5 = vsub.f32 %v3393_v36, %v1809_v51 }
 0x81c   : > { %v1822_v53 = vsub.f32 %v1818_v52, %v1820_v49 }
 0x81d   : > { %v1817_v54 = vpop.xlane.xlu0 %1816 }
 0x81e   : > { %v1826_v58 = vadd.f32 1e-05, %v1822_v53  ;;  %v1819_v59 = vmul.f32 0.03125, %v1817_v54 }
 0x820   : > { %2651 = vrsqrt.f32 %v1826_v58  ;;  %v1823_v61 = vsub.f32 %v1819_v59, %v1821_v55 }
 0x822   : > { %v1827_v4 = vadd.f32 1e-05, %v1823_v61 }
 0x824   : > { %2653 = vrsqrt.f32 %v1827_v4 }
 0x82a   : > { %v2652_v62 = vpop.eup %2651 }
 0x82b   : > { %v1830_v63 = vmul.f32 %v2652_v62, %v1824_v50 }
 0x82d   : > { %v1838_v8 = vmul.f32 %v2288_v0, %v1830_v63 }
 0x82e   : > { %v2654_v6 = vpop.eup %2653 }
 0x82f   : > { %v1831_v7 = vmul.f32 %v2654_v6, %v1825_v5  ;;  %v1846_v12 = vadd.f32 %v2289_v9, %v1838_v8 }
 0x831   : > { %v1839_v10 = vmul.f32 %v2288_v0, %v1831_v7 }
 0x833   : > { %v1847_v13 = vadd.f32 %v2289_v9, %v1839_v10 }
 0x835   : > { %v1848_v14 = vpack.c.bf16 %v1847_v13, %v1846_v12 }
 0x837   : > { %2479 = vmatmul.mubr.msk.bf16.vlgmr.msra.gmra.mrb[40].mxu0 %vm670_vm1, %v1848_v14 }
 0x90a   : > { %v1909_v24 = vpop.f32.mrb[40].mxu0 }
 0x90b   : > { %v1910_v25 = vadd.f32 %v2290_v22, %v1909_v24  ;;  %v2480_v56 = vpop.f32.mrb[41].mxu0 }
 0x90c   : > { %v1912_v48 = vpop.f32.mrb[42].mxu0 }
 0x90d   : > { %v1918_v57 = vmul.f32 0.044715, %v1910_v25  ;;  %v1913_v23 = vadd.f32 %v2290_v22, %v1912_v48  ;;  %v2481_v26 = vpop.f32.mrb[43].mxu0  ;;  %v1916_v39 = vmul.f32 0.5, %v1910_v25 }
 0x90f   : > { %v1920_v27 = vmul.f32 %v1918_v57, %v1910_v25  ;;  %v1919_v28 = vmul.f32 0.044715, %v1913_v23  ;;  %v1917_v2 = vmul.f32 0.5, %v1913_v23 }
 0x911   : > { %v1922_v29 = vmul.f32 %v1920_v27, %v1910_v25  ;;  %v1921_v30 = vmul.f32 %v1919_v28, %v1913_v23 }
 0x913   : > { %v1924_v31 = vadd.f32 %v1922_v29, %v1910_v25  ;;  %v1923_v32 = vmul.f32 %v1921_v30, %v1913_v23 }
 0x915   : > { %v1926_v11 = vmul.f32 0.7978846, %v1924_v31  ;;  %v1925_v33 = vadd.f32 %v1923_v32, %v1913_v23 }
 0x917   : > { %2655 = vtanh.f32 %v1926_v11  ;;  %v1927_v34 = vmul.f32 0.7978846, %v1925_v33 }
 0x919   : > { %2657 = vtanh.f32 %v1927_v34 }
 0x921   : > { %v2656_v60 = vpop.eup %2655 }
 0x922   : > { %v1930_v37 = vadd.f32 1.0, %v2656_v60 }
 0x923   : > { %v2658_v38 = vpop.eup %2657 }
 0x924   : > { %v1931_v40 = vadd.f32 1.0, %v2658_v38  ;;  %v1932_v41 = vmul.f32 %v1930_v37, %v1916_v39 }
 0x926   : > { %v1933_v3 = vmul.f32 %v1931_v40, %v1917_v2 }
 0x928   : > { %v1934_v42 = vpack.c.bf16 %v1933_v3, %v1932_v41 }
 0x92a   : > { %2499 = vmatmul.mubr.bf16.vlgmr.msra.gmra.mrb[32].mxu1 %v1934_v42 }
 0x9fd   : > { %v2040_v44 = vpop.f32.mrb[32].mxu1 }
 0x9fe   : > { %v2041_v45 = vadd.f32 %v2294_v43, %v2040_v44  ;;  %v2500_v46 = vpop.f32.mrb[33].mxu1  ;;  %2054 = sbr.rel (%p2303_p7) target bundleno = 2565 (0xa05), region = 92 }
 0x9ff   : > { %v2043_v47 = vpop.f32.mrb[34].mxu1 }
 0xa00   : > { %v2047_v49 = vadd.f32 %v2041_v45, %v3390_v35  ;;  %v2044_v51 = vadd.f32 %v2294_v43, %v2043_v47  ;;  %v2501_v52 = vpop.f32.mrb[35].mxu1 }
 0xa02   : > { %2049 = vst.msk [vmem:[#allocation2] sm:$0xff] %vm670_vm1, %v2047_v49  ;;  %v2048_v53 = vadd.f32 %v2044_v51, %v3393_v36  ;;  %2055 = vst.msk [vmem:[#allocation9] sm:$0xff] (!%p2303_p7), %vm670_vm1, %v2047_v49 }
 0xa04   : > { %2050 = vst.msk [vmem:[#allocation2 + $0x8] sm:$0xff] %vm670_vm1, %v2048_v53  ;;  %2056 = vst.msk [vmem:[#allocation9 + $0x8] sm:$0xff] (!%p2303_p7), %vm670_vm1, %v2048_v53 }
 0xa05 PF: > { %p2523_p9 = scmp.eq.s32.totalorder %s2925_s29, 1  ;;  %s2834_s27 = smov [#allocation9]  }
 0xa06   : > { %s2063_s22 = sshll.u32 %s2834_s27, 4  ;;  %s2064_s22 = int_to_ptr.vmem [resolvable:$true] %s2063_s22 }
 0xa07   : > { %s2749_s12 = scalar_lea.vmem %s2064_s22, 256  ;;  %p2756_p6 = scmp.lt.s32.totalorder %s2064_s22, %s2064_s22 }
 0xa08   : > { %p2750_p0 = scmp.ne.s32.totalorder %s2064_s22, %s2749_s12  ;;  %p2757_p10 = scmp.lt.s32.totalorder %s2749_s12, %s2749_s12 }
 0xa0a   : > { %p2751_p3 = pnand %p2750_p0, %p2523_p9  ;;  %p2758_p4 = por %p2757_p10, %p2756_p6 }
 0xa0c   : > { %p2752_p5 = pneg %p2751_p3 }
 0xa0e   : > { %p2759_p13 = pnand %p2758_p4, %p2752_p5 }
 0xa10   : > { %2762 = shalt.err (!%p2759_p13)
}
 0xa11   : > { %s3547_s30 = sld [smem:[#allocation21_spill]] }
 0xa17   : > { %s2763_s3 = scalar_lea.hbm %s3547_s30, 256 }
 0xa18   : > { %p2764_p1 = scmp.ne.s32.totalorder %s3547_s30, %s2763_s3  ;;  %p2769_p8 = scmp.lt.u32.totalorder %s2763_s3, %s3547_s30 }
 0xa1a   : > { %p2765_p12 = pnand %p2764_p1, %p2523_p9 }
 0xa1c   : > { %p2766_p11 = pneg %p2765_p12 }
 0xa1e   : > { %p2771_p2 = pnand %p2769_p8, %p2766_p11 }
 0xa20   : > { %2774 = shalt.err (!%p2771_p2)
}
 0xa21   : > { %s2835_s13 = smov 128  }
 0xa22   : > { %2509 = dma.vmem_to_hbm [thread:$0]  (%p2523_p9), %s2064_s22, 256, %s3547_s30, [#allocation5], %s2835_s13, %s2835_s13, %s2831_s17  }
 0xa23   : > { %2800 = dma.done.wait (%p2523_p9), [#allocation5], 256  }
 0xa24   : > { %2802 = vsyncadd (%p2523_p9), [#allocation5], 4294967040 }
 0xa25 PF: > { %s3548_s28 = sld [smem:[#allocation14_spill]]  ;;  %s3549_s21 = sld [smem:[#allocation13_spill]] }
 0xa26   : > { %s3550_s27 = sld [smem:[#allocation15_spill]]  ;;  %s3551_s25 = smov %s2809_s26 }
 0xa2b   : > { %p27_p7 = scmp.ge.s32.totalorder %s3548_s28, 4   ;;  %s3552_s26 = smov %s3549_s21 }
 0xa2d   :  { %29 = sbr.rel (!%p27_p7) target bundleno = 13 (0xd), region = 168 }
 0xa34   :  { %2079 = vsyncpa [#allocation4], 1 }
 0xa35   :  { %2081 = vsyncpa [#allocation4 + $0x1], 1 }
 0xa36   :  { %2082 = vsyncpa [#allocation7], 1 }
 0xa37   :  { %2084 = vsyncpa [#allocation7 + $0x1], 1 }
 0xa38   :  { %2085 = vsyncpa [#allocation5], 1 }
 0xa39   :  { %2087 = vsyncpa [#allocation5 + $0x1], 1 }

</bundles_post_ra>
